<compile_context>
chip_gen: v7x
topology: tpu7x:2x2x1
jax: 0.10.0
libtpu: 0.0.40
codegen_flags: <defaults>
</compile_context>

<pallas_src>
import functools
import math

import jax
import jax.numpy as jnp
from jax.experimental import pallas as pl
from jax.experimental.pallas import tpu as pltpu


# ---------------------------------------------------------------------------
# in-kernel helpers
# ---------------------------------------------------------------------------
def _layernorm(x, w, b, eps=1e-5):
    mu = jnp.mean(x, axis=-1, keepdims=True)
    var = jnp.mean((x - mu) ** 2, axis=-1, keepdims=True)
    return (x - mu) * jax.lax.rsqrt(var + eps) * w + b


# ---------------------------------------------------------------------------
# fused kernel: num_hops x [MHA(q, kv, kv) -> residual -> LN], then
# fc -> residual(original query) -> LN.   Single invocation (grid=()),
# batch + heads folded into one batched-matmul axis g = B * nhead.
# ---------------------------------------------------------------------------
def mhda_mhpa_kernel(q_ref, kv_ref,
                     wqkv_ref,   # (3*hops, nhead, D, hd)  rows per hop: [q, k, v]
                     bqkv_ref,   # (3*hops, nhead, hd)
                     wo_ref,     # (hops, nhead, hd, D)
                     fcw_ref,    # (D, D)
                     vecs_ref,   # (3*hops + 3, D): per hop [bo, lnw, lnb]; then [fcb, flnw, flnb]
                     out_ref,
                     *, nhead, num_hops):
    f32 = jnp.float32
    x0 = q_ref[...].astype(f32)          # (B, Lq, D)  original query (final residual)
    kv = kv_ref[...].astype(f32)         # (B, Lk, D)
    B, Lq, D = x0.shape
    Lk = kv.shape[1]
    G = B * nhead

    def tile_b(w):
        # Replicate a per-head tensor across the batch and fold (B, H) -> G.
        # Only touches leading (non-tiled) dims -> cheap vreg replication.
        return jnp.broadcast_to(w[None], (B,) + w.shape).reshape(
            (B * w.shape[0],) + w.shape[1:])

    # kv replicated per (batch, head) group -- hoisted, reused by every hop.
    kvg = jnp.broadcast_to(kv[:, None], (B, nhead, Lk, D)).reshape(G, Lk, D)

    x = x0
    for h in range(num_hops):            # static unroll (num_hops is small)
        wq = tile_b(wqkv_ref[3 * h + 0])             # (G, D, hd)  (scale pre-folded)
        wk = tile_b(wqkv_ref[3 * h + 1])
        wv = tile_b(wqkv_ref[3 * h + 2])
        bq = tile_b(bqkv_ref[3 * h + 0])[:, None, :]  # (G, 1, hd)
        bk = tile_b(bqkv_ref[3 * h + 1])[:, None, :]
        bv = tile_b(bqkv_ref[3 * h + 2])[:, None, :]

        xg = jnp.broadcast_to(x[:, None], (B, nhead, Lq, D)).reshape(G, Lq, D)

        # Per-(batch, head) projections: single-batch-dim batched matmuls.
        qg = jnp.einsum('gqd,gde->gqe', xg, wq, preferred_element_type=f32) + bq
        kg = jnp.einsum('gkd,gde->gke', kvg, wk, preferred_element_type=f32) + bk
        vg = jnp.einsum('gkd,gde->gke', kvg, wv, preferred_element_type=f32) + bv

        # scores + softmax (exact normalization for reference fidelity)
        s = jnp.einsum('gqe,gke->gqk', qg, kg, preferred_element_type=f32)
        s = s - jnp.max(s, axis=-1, keepdims=True)
        p = jnp.exp(s)
        p = p / jnp.sum(p, axis=-1, keepdims=True)

        ctx = jnp.einsum('gqk,gke->gqe', p, vg, preferred_element_type=f32)

        # Output projection per head, then sum over heads (the head-concat is
        # absorbed into the per-head (hd, D) weights + the sum).
        og = jnp.einsum('gqe,ged->gqd', ctx, tile_b(wo_ref[h]),
                        preferred_element_type=f32)                 # (G, Lq, D)
        attn = og.reshape(B, nhead, Lq, D).sum(axis=1) + vecs_ref[3 * h + 0]

        # residual + layernorm   (dropout = identity in eval)
        x = _layernorm(x + attn, vecs_ref[3 * h + 1], vecs_ref[3 * h + 2])

    # final fc + residual with ORIGINAL query + layernorm
    r = 3 * num_hops
    y = jnp.dot(x.reshape(B * Lq, D), fcw_ref[...], preferred_element_type=f32)
    y = y.reshape(B, Lq, D) + vecs_ref[r + 0]
    y = _layernorm(y + x0, vecs_ref[r + 1], vecs_ref[r + 2])
    out_ref[...] = y.astype(out_ref.dtype)


def mhda_mhpa_forward(query, key_value, params, *, nhead, num_hops):
    w_qkv, b_qkv, w_o, w_fc, vecs = params
    B, Lq, D = query.shape
    Lk = key_value.shape[1]

    kernel = functools.partial(mhda_mhpa_kernel, nhead=nhead, num_hops=num_hops)

    flops = 2 * B * Lq * D * D                                   # final fc
    flops += num_hops * (2 * B * (Lq + 2 * Lk) * D * D           # q/k/v projections
                         + 4 * B * Lq * Lk * D                   # scores + context
                         + 2 * B * Lq * D * D)                   # out projection
    bytes_accessed = sum(int(a.size) * a.dtype.itemsize
                         for a in (query, key_value, w_qkv, b_qkv, w_o, w_fc, vecs))
    bytes_accessed += B * Lq * D * query.dtype.itemsize          # output
    cost = pl.CostEstimate(flops=int(flops),
                           transcendentals=int(num_hops * B * nhead * Lq * Lk),
                           bytes_accessed=int(bytes_accessed))

    # grid=() -> one invocation; every operand is a whole-array VMEM block.
    # TODO(synk): for large B on v7x, add a leading CORE_PARALLEL batch axis so
    # both TensorCores get work; at B=2 / D=32 it is not worth the split.
    vmem = pl.BlockSpec(memory_space=pltpu.MemorySpace.VMEM)
    return pl.pallas_call(
        kernel,
        out_shape=jax.ShapeDtypeStruct((B, Lq, D), query.dtype),
        in_specs=[vmem] * 7,
        out_specs=vmem,
        cost_estimate=cost,
    )(query, key_value, w_qkv, b_qkv, w_o, w_fc, vecs)


# ---------------------------------------------------------------------------
# deterministic synthetic parameters (PyTorch-equivalent layouts, pre-packed
# into per-(hop, head) slabs so the kernel never slices heads out of lanes)
# ---------------------------------------------------------------------------
def init_params(key, d_model, nhead, num_hops):
    D = d_model
    hd = D // nhead
    scale = 1.0 / math.sqrt(hd)

    def lin(k, fan_in, shape):
        bound = 1.0 / math.sqrt(fan_in)
        return jax.random.uniform(k, shape, jnp.float32, -bound, bound)

    def split_heads_cols(w_t):       # (D, D) in x@W layout -> (nhead, D, hd)
        return jnp.transpose(w_t.reshape(D, nhead, hd), (1, 0, 2))

    ones = jnp.ones((D,), jnp.float32)
    zeros = jnp.zeros((D,), jnp.float32)

    w_qkv_rows, b_qkv_rows, w_o_l, vec_rows = [], [], [], []
    for hop in range(num_hops):
        ks = jax.random.split(jax.random.fold_in(key, hop), 4)
        in_w = lin(ks[0], D, (3 * D, D))     # torch in_proj_weight layout
        in_b = lin(ks[1], D, (3 * D,))
        out_w = lin(ks[2], D, (D, D))        # torch out_proj.weight layout
        out_b = lin(ks[3], D, (D,))

        wq_t = in_w[0:D].T * scale           # fold 1/sqrt(hd) into Wq, bq
        wk_t = in_w[D:2 * D].T
        wv_t = in_w[2 * D:3 * D].T
        bq = in_b[0:D] * scale
        bk = in_b[D:2 * D]
        bv = in_b[2 * D:3 * D]

        w_qkv_rows += [split_heads_cols(wq_t),
                       split_heads_cols(wk_t),
                       split_heads_cols(wv_t)]                 # each (nhead, D, hd)
        b_qkv_rows += [bq.reshape(nhead, hd),
                       bk.reshape(nhead, hd),
                       bv.reshape(nhead, hd)]                  # each (nhead, hd)
        w_o_l.append(out_w.T.reshape(nhead, hd, D))            # per-head (hd, D)
        vec_rows += [out_b, ones, zeros]                       # [bo, lnw, lnb]

    kf = jax.random.split(jax.random.fold_in(key, 1000), 2)
    fcw = lin(kf[0], D, (D, D)).T
    fcb = lin(kf[1], D, (D,))
    vec_rows += [fcb, ones, zeros]                             # [fcb, flnw, flnb]

    w_qkv = jnp.stack(w_qkv_rows)        # (3*hops, nhead, D, hd)
    b_qkv = jnp.stack(b_qkv_rows)        # (3*hops, nhead, hd)
    w_o = jnp.stack(w_o_l)               # (hops, nhead, hd, D)
    vecs = jnp.stack(vec_rows)           # (3*hops + 3, D)
    return (w_qkv, b_qkv, w_o, fcw, vecs)


if __name__ == "__main__":
    d_model, nhead, num_hops = 32, 4, 2
    B, Lq, Lk = 2, 8, 8

    root = jax.random.PRNGKey(0)
    kq, kkv, kp = jax.random.split(root, 3)
    query = jax.random.normal(kq, (B, Lq, d_model), jnp.float32)
    key_value = jax.random.normal(kkv, (B, Lk, d_model), jnp.float32)

    params = init_params(kp, d_model, nhead, num_hops)

    out = mhda_mhpa_forward(query, key_value, params, nhead=nhead, num_hops=num_hops)
    out = jax.block_until_ready(out)
    assert out.shape == (B, Lq, d_model)
    print("KERNEL_OK")
</pallas_src>

<mosaic_0001>
module attributes {stable_mosaic.version = 11 : i64} {
  func.func @mhda_mhpa_kernel(%arg0: memref<2x8x32xf32, #tpu.memory_space<vmem>>, %arg1: memref<2x8x32xf32, #tpu.memory_space<vmem>>, %arg2: memref<6x4x32x8xf32, #tpu.memory_space<vmem>>, %arg3: memref<6x4x8xf32, #tpu.memory_space<vmem>>, %arg4: memref<2x4x8x32xf32, #tpu.memory_space<vmem>>, %arg5: memref<32x32xf32, #tpu.memory_space<vmem>>, %arg6: memref<9x32xf32, #tpu.memory_space<vmem>>, %arg7: memref<2x8x32xf32, #tpu.memory_space<vmem>>) attributes {dimension_semantics = [], scalar_prefetch = 0 : i64, scratch_operands = 0 : i64, tpu.core_type = #tpu.core_type<tc>} {
    %c0 = arith.constant 0 : index
    %c0_0 = arith.constant 0 : index
    %c0_1 = arith.constant 0 : index
    %0 = vector.load %arg0[%c0, %c0_0, %c0_1] : memref<2x8x32xf32, #tpu.memory_space<vmem>>, vector<2x8x32xf32>
    %c0_2 = arith.constant 0 : index
    %c0_3 = arith.constant 0 : index
    %c0_4 = arith.constant 0 : index
    %1 = vector.load %arg1[%c0_2, %c0_3, %c0_4] : memref<2x8x32xf32, #tpu.memory_space<vmem>>, vector<2x8x32xf32>
    %2 = vector.shape_cast %1 : vector<2x8x32xf32> to vector<2x1x8x32xf32>
    %3 = vector.shape_cast %2 : vector<2x1x8x32xf32> to vector<2x1x8x32xf32>
    %4 = vector.broadcast %3 : vector<2x1x8x32xf32> to vector<2x4x8x32xf32>
    %5 = vector.shape_cast %4 : vector<2x4x8x32xf32> to vector<8x8x32xf32>
    %c0_5 = arith.constant 0 : index
    %c0_6 = arith.constant 0 : index
    %c0_7 = arith.constant 0 : index
    %c0_8 = arith.constant 0 : index
    %6 = vector.load %arg2[%c0_5, %c0_6, %c0_7, %c0_8] : memref<6x4x32x8xf32, #tpu.memory_space<vmem>>, vector<1x4x32x8xf32>
    %7 = vector.shape_cast %6 : vector<1x4x32x8xf32> to vector<4x32x8xf32>
    %8 = vector.shape_cast %7 : vector<4x32x8xf32> to vector<1x4x32x8xf32>
    %9 = vector.shape_cast %8 : vector<1x4x32x8xf32> to vector<1x4x32x8xf32>
    %10 = vector.broadcast %9 : vector<1x4x32x8xf32> to vector<2x4x32x8xf32>
    %11 = vector.shape_cast %10 : vector<2x4x32x8xf32> to vector<8x32x8xf32>
    %c1 = arith.constant 1 : index
    %c0_9 = arith.constant 0 : index
    %c0_10 = arith.constant 0 : index
    %c0_11 = arith.constant 0 : index
    %12 = vector.load %arg2[%c1, %c0_9, %c0_10, %c0_11] : memref<6x4x32x8xf32, #tpu.memory_space<vmem>>, vector<1x4x32x8xf32>
    %13 = vector.shape_cast %12 : vector<1x4x32x8xf32> to vector<4x32x8xf32>
    %14 = vector.shape_cast %13 : vector<4x32x8xf32> to vector<1x4x32x8xf32>
    %15 = vector.shape_cast %14 : vector<1x4x32x8xf32> to vector<1x4x32x8xf32>
    %16 = vector.broadcast %15 : vector<1x4x32x8xf32> to vector<2x4x32x8xf32>
    %17 = vector.shape_cast %16 : vector<2x4x32x8xf32> to vector<8x32x8xf32>
    %c2 = arith.constant 2 : index
    %c0_12 = arith.constant 0 : index
    %c0_13 = arith.constant 0 : index
    %c0_14 = arith.constant 0 : index
    %18 = vector.load %arg2[%c2, %c0_12, %c0_13, %c0_14] : memref<6x4x32x8xf32, #tpu.memory_space<vmem>>, vector<1x4x32x8xf32>
    %19 = vector.shape_cast %18 : vector<1x4x32x8xf32> to vector<4x32x8xf32>
    %20 = vector.shape_cast %19 : vector<4x32x8xf32> to vector<1x4x32x8xf32>
    %21 = vector.shape_cast %20 : vector<1x4x32x8xf32> to vector<1x4x32x8xf32>
    %22 = vector.broadcast %21 : vector<1x4x32x8xf32> to vector<2x4x32x8xf32>
    %23 = vector.shape_cast %22 : vector<2x4x32x8xf32> to vector<8x32x8xf32>
    %c0_15 = arith.constant 0 : index
    %c0_16 = arith.constant 0 : index
    %c0_17 = arith.constant 0 : index
    %24 = vector.load %arg3[%c0_15, %c0_16, %c0_17] : memref<6x4x8xf32, #tpu.memory_space<vmem>>, vector<1x4x8xf32>
    %25 = vector.shape_cast %24 : vector<1x4x8xf32> to vector<4x8xf32>
    %26 = vector.shape_cast %25 : vector<4x8xf32> to vector<1x4x8xf32>
    %27 = vector.shape_cast %26 : vector<1x4x8xf32> to vector<1x4x8xf32>
    %28 = vector.broadcast %27 : vector<1x4x8xf32> to vector<2x4x8xf32>
    %29 = vector.shape_cast %28 : vector<2x4x8xf32> to vector<8x8xf32>
    %30 = vector.shape_cast %29 : vector<8x8xf32> to vector<8x1x8xf32>
    %c1_18 = arith.constant 1 : index
    %c0_19 = arith.constant 0 : index
    %c0_20 = arith.constant 0 : index
    %31 = vector.load %arg3[%c1_18, %c0_19, %c0_20] : memref<6x4x8xf32, #tpu.memory_space<vmem>>, vector<1x4x8xf32>
    %32 = vector.shape_cast %31 : vector<1x4x8xf32> to vector<4x8xf32>
    %33 = vector.shape_cast %32 : vector<4x8xf32> to vector<1x4x8xf32>
    %34 = vector.shape_cast %33 : vector<1x4x8xf32> to vector<1x4x8xf32>
    %35 = vector.broadcast %34 : vector<1x4x8xf32> to vector<2x4x8xf32>
    %36 = vector.shape_cast %35 : vector<2x4x8xf32> to vector<8x8xf32>
    %37 = vector.shape_cast %36 : vector<8x8xf32> to vector<8x1x8xf32>
    %c2_21 = arith.constant 2 : index
    %c0_22 = arith.constant 0 : index
    %c0_23 = arith.constant 0 : index
    %38 = vector.load %arg3[%c2_21, %c0_22, %c0_23] : memref<6x4x8xf32, #tpu.memory_space<vmem>>, vector<1x4x8xf32>
    %39 = vector.shape_cast %38 : vector<1x4x8xf32> to vector<4x8xf32>
    %40 = vector.shape_cast %39 : vector<4x8xf32> to vector<1x4x8xf32>
    %41 = vector.shape_cast %40 : vector<1x4x8xf32> to vector<1x4x8xf32>
    %42 = vector.broadcast %41 : vector<1x4x8xf32> to vector<2x4x8xf32>
    %43 = vector.shape_cast %42 : vector<2x4x8xf32> to vector<8x8xf32>
    %44 = vector.shape_cast %43 : vector<8x8xf32> to vector<8x1x8xf32>
    %45 = vector.shape_cast %0 : vector<2x8x32xf32> to vector<2x1x8x32xf32>
    %46 = vector.shape_cast %45 : vector<2x1x8x32xf32> to vector<2x1x8x32xf32>
    %47 = vector.broadcast %46 : vector<2x1x8x32xf32> to vector<2x4x8x32xf32>
    %48 = vector.shape_cast %47 : vector<2x4x8x32xf32> to vector<8x8x32xf32>
    "tpu.trace_start"() <{level = 10 : i32, message = "gqd,gde->gqe"}> : () -> ()
    %cst = arith.constant dense<0.000000e+00> : vector<8x8x8xf32>
    %49 = tpu.matmul %48, %11, %cst {dimension_numbers = #tpu.dot_dimension_numbers<[2], [1], [1], [2], [0, 0, 0, 1, 1, 2], [0], [0]>} : vector<8x8x32xf32>, vector<8x32x8xf32>, vector<8x8x8xf32> -> vector<8x8x8xf32>
    "tpu.trace_stop"() : () -> ()
    %50 = vector.broadcast %30 : vector<8x1x8xf32> to vector<8x8x8xf32>
    %51 = arith.addf %49, %50 : vector<8x8x8xf32>
    "tpu.trace_start"() <{level = 10 : i32, message = "gkd,gde->gke"}> : () -> ()
    %cst_24 = arith.constant dense<0.000000e+00> : vector<8x8x8xf32>
    %52 = tpu.matmul %5, %17, %cst_24 {dimension_numbers = #tpu.dot_dimension_numbers<[2], [1], [1], [2], [0, 0, 0, 1, 1, 2], [0], [0]>} : vector<8x8x32xf32>, vector<8x32x8xf32>, vector<8x8x8xf32> -> vector<8x8x8xf32>
    "tpu.trace_stop"() : () -> ()
    %53 = vector.broadcast %37 : vector<8x1x8xf32> to vector<8x8x8xf32>
    %54 = arith.addf %52, %53 : vector<8x8x8xf32>
    "tpu.trace_start"() <{level = 10 : i32, message = "gkd,gde->gke"}> : () -> ()
    %cst_25 = arith.constant dense<0.000000e+00> : vector<8x8x8xf32>
    %55 = tpu.matmul %5, %23, %cst_25 {dimension_numbers = #tpu.dot_dimension_numbers<[2], [1], [1], [2], [0, 0, 0, 1, 1, 2], [0], [0]>} : vector<8x8x32xf32>, vector<8x32x8xf32>, vector<8x8x8xf32> -> vector<8x8x8xf32>
    "tpu.trace_stop"() : () -> ()
    %56 = vector.broadcast %44 : vector<8x1x8xf32> to vector<8x8x8xf32>
    %57 = arith.addf %55, %56 : vector<8x8x8xf32>
    "tpu.trace_start"() <{level = 10 : i32, message = "gqe,gke->gqk"}> : () -> ()
    %cst_26 = arith.constant dense<0.000000e+00> : vector<8x8x8xf32>
    %58 = tpu.matmul %51, %54, %cst_26 {dimension_numbers = #tpu.dot_dimension_numbers<[2], [2], [1], [1], [0, 0, 0, 1, 1, 1], [0], [0]>} : vector<8x8x8xf32>, vector<8x8x8xf32>, vector<8x8x8xf32> -> vector<8x8x8xf32>
    "tpu.trace_stop"() : () -> ()
    %cst_27 = arith.constant dense<0xFF800000> : vector<8x8xf32>
    %59 = vector.multi_reduction <maximumf>, %58, %cst_27 [2] : vector<8x8x8xf32> to vector<8x8xf32>
    %60 = vector.shape_cast %59 : vector<8x8xf32> to vector<8x8x1xf32>
    %61 = vector.broadcast %60 : vector<8x8x1xf32> to vector<8x8x8xf32>
    %62 = arith.subf %58, %61 : vector<8x8x8xf32>
    %63 = math.exp %62 : vector<8x8x8xf32>
    %cst_28 = arith.constant dense<0.000000e+00> : vector<8x8xf32>
    %64 = vector.multi_reduction <add>, %63, %cst_28 [2] : vector<8x8x8xf32> to vector<8x8xf32>
    %65 = vector.shape_cast %64 : vector<8x8xf32> to vector<8x8x1xf32>
    %66 = vector.broadcast %65 : vector<8x8x1xf32> to vector<8x8x8xf32>
    %67 = arith.divf %63, %66 : vector<8x8x8xf32>
    "tpu.trace_start"() <{level = 10 : i32, message = "gqk,gke->gqe"}> : () -> ()
    %cst_29 = arith.constant dense<0.000000e+00> : vector<8x8x8xf32>
    %68 = tpu.matmul %67, %57, %cst_29 {dimension_numbers = #tpu.dot_dimension_numbers<[2], [1], [1], [2], [0, 0, 0, 1, 1, 2], [0], [0]>} : vector<8x8x8xf32>, vector<8x8x8xf32>, vector<8x8x8xf32> -> vector<8x8x8xf32>
    "tpu.trace_stop"() : () -> ()
    %c0_30 = arith.constant 0 : index
    %c0_31 = arith.constant 0 : index
    %c0_32 = arith.constant 0 : index
    %c0_33 = arith.constant 0 : index
    %69 = vector.load %arg4[%c0_30, %c0_31, %c0_32, %c0_33] : memref<2x4x8x32xf32, #tpu.memory_space<vmem>>, vector<1x4x8x32xf32>
    %70 = vector.shape_cast %69 : vector<1x4x8x32xf32> to vector<4x8x32xf32>
    %71 = vector.shape_cast %70 : vector<4x8x32xf32> to vector<1x4x8x32xf32>
    %72 = vector.shape_cast %71 : vector<1x4x8x32xf32> to vector<1x4x8x32xf32>
    %73 = vector.broadcast %72 : vector<1x4x8x32xf32> to vector<2x4x8x32xf32>
    %74 = vector.shape_cast %73 : vector<2x4x8x32xf32> to vector<8x8x32xf32>
    "tpu.trace_start"() <{level = 10 : i32, message = "gqe,ged->gqd"}> : () -> ()
    %cst_34 = arith.constant dense<0.000000e+00> : vector<8x8x32xf32>
    %75 = tpu.matmul %68, %74, %cst_34 {dimension_numbers = #tpu.dot_dimension_numbers<[2], [1], [1], [2], [0, 0, 0, 1, 1, 2], [0], [0]>} : vector<8x8x8xf32>, vector<8x8x32xf32>, vector<8x8x32xf32> -> vector<8x8x32xf32>
    "tpu.trace_stop"() : () -> ()
    %76 = vector.shape_cast %75 : vector<8x8x32xf32> to vector<2x4x8x32xf32>
    %cst_35 = arith.constant dense<0.000000e+00> : vector<2x8x32xf32>
    %77 = vector.multi_reduction <add>, %76, %cst_35 [1] : vector<2x4x8x32xf32> to vector<2x8x32xf32>
    %c0_36 = arith.constant 0 : index
    %c0_37 = arith.constant 0 : index
    %78 = vector.load %arg6[%c0_36, %c0_37] : memref<9x32xf32, #tpu.memory_space<vmem>>, vector<1x32xf32>
    %79 = vector.shape_cast %78 : vector<1x32xf32> to vector<32xf32>
    %80 = vector.shape_cast %79 : vector<32xf32> to vector<1x1x32xf32>
    %81 = vector.broadcast %80 : vector<1x1x32xf32> to vector<2x8x32xf32>
    %82 = arith.addf %77, %81 : vector<2x8x32xf32>
    %83 = arith.addf %0, %82 : vector<2x8x32xf32>
    %c1_38 = arith.constant 1 : index
    %c0_39 = arith.constant 0 : index
    %84 = vector.load %arg6[%c1_38, %c0_39] : memref<9x32xf32, #tpu.memory_space<vmem>>, vector<1x32xf32>
    %85 = vector.shape_cast %84 : vector<1x32xf32> to vector<32xf32>
    %c2_40 = arith.constant 2 : index
    %c0_41 = arith.constant 0 : index
    %86 = vector.load %arg6[%c2_40, %c0_41] : memref<9x32xf32, #tpu.memory_space<vmem>>, vector<1x32xf32>
    %87 = vector.shape_cast %86 : vector<1x32xf32> to vector<32xf32>
    %cst_42 = arith.constant dense<0.000000e+00> : vector<2x8xf32>
    %88 = vector.multi_reduction <add>, %83, %cst_42 [2] : vector<2x8x32xf32> to vector<2x8xf32>
    %89 = vector.shape_cast %88 : vector<2x8xf32> to vector<2x8x1xf32>
    %cst_43 = arith.constant 3.200000e+01 : f32
    %90 = vector.broadcast %cst_43 : f32 to vector<2x8x1xf32>
    %91 = arith.divf %89, %90 : vector<2x8x1xf32>
    %92 = vector.broadcast %91 : vector<2x8x1xf32> to vector<2x8x32xf32>
    %93 = arith.subf %83, %92 : vector<2x8x32xf32>
    %94 = arith.mulf %93, %93 : vector<2x8x32xf32>
    %cst_44 = arith.constant dense<0.000000e+00> : vector<2x8xf32>
    %95 = vector.multi_reduction <add>, %94, %cst_44 [2] : vector<2x8x32xf32> to vector<2x8xf32>
    %96 = vector.shape_cast %95 : vector<2x8xf32> to vector<2x8x1xf32>
    %cst_45 = arith.constant 3.200000e+01 : f32
    %97 = vector.broadcast %cst_45 : f32 to vector<2x8x1xf32>
    %98 = arith.divf %96, %97 : vector<2x8x1xf32>
    %99 = vector.broadcast %91 : vector<2x8x1xf32> to vector<2x8x32xf32>
    %100 = arith.subf %83, %99 : vector<2x8x32xf32>
    %cst_46 = arith.constant 9.99999974E-6 : f32
    %101 = vector.broadcast %cst_46 : f32 to vector<2x8x1xf32>
    %102 = arith.addf %98, %101 : vector<2x8x1xf32>
    %103 = math.rsqrt %102 : vector<2x8x1xf32>
    %104 = vector.broadcast %103 : vector<2x8x1xf32> to vector<2x8x32xf32>
    %105 = arith.mulf %100, %104 : vector<2x8x32xf32>
    %106 = vector.shape_cast %85 : vector<32xf32> to vector<1x1x32xf32>
    %107 = vector.broadcast %106 : vector<1x1x32xf32> to vector<2x8x32xf32>
    %108 = arith.mulf %105, %107 : vector<2x8x32xf32>
    %109 = vector.shape_cast %87 : vector<32xf32> to vector<1x1x32xf32>
    %110 = vector.broadcast %109 : vector<1x1x32xf32> to vector<2x8x32xf32>
    %111 = arith.addf %108, %110 : vector<2x8x32xf32>
    %c3 = arith.constant 3 : index
    %c0_47 = arith.constant 0 : index
    %c0_48 = arith.constant 0 : index
    %c0_49 = arith.constant 0 : index
    %112 = vector.load %arg2[%c3, %c0_47, %c0_48, %c0_49] : memref<6x4x32x8xf32, #tpu.memory_space<vmem>>, vector<1x4x32x8xf32>
    %113 = vector.shape_cast %112 : vector<1x4x32x8xf32> to vector<4x32x8xf32>
    %114 = vector.shape_cast %113 : vector<4x32x8xf32> to vector<1x4x32x8xf32>
    %115 = vector.shape_cast %114 : vector<1x4x32x8xf32> to vector<1x4x32x8xf32>
    %116 = vector.broadcast %115 : vector<1x4x32x8xf32> to vector<2x4x32x8xf32>
    %117 = vector.shape_cast %116 : vector<2x4x32x8xf32> to vector<8x32x8xf32>
    %c4 = arith.constant 4 : index
    %c0_50 = arith.constant 0 : index
    %c0_51 = arith.constant 0 : index
    %c0_52 = arith.constant 0 : index
    %118 = vector.load %arg2[%c4, %c0_50, %c0_51, %c0_52] : memref<6x4x32x8xf32, #tpu.memory_space<vmem>>, vector<1x4x32x8xf32>
    %119 = vector.shape_cast %118 : vector<1x4x32x8xf32> to vector<4x32x8xf32>
    %120 = vector.shape_cast %119 : vector<4x32x8xf32> to vector<1x4x32x8xf32>
    %121 = vector.shape_cast %120 : vector<1x4x32x8xf32> to vector<1x4x32x8xf32>
    %122 = vector.broadcast %121 : vector<1x4x32x8xf32> to vector<2x4x32x8xf32>
    %123 = vector.shape_cast %122 : vector<2x4x32x8xf32> to vector<8x32x8xf32>
    %c5 = arith.constant 5 : index
    %c0_53 = arith.constant 0 : index
    %c0_54 = arith.constant 0 : index
    %c0_55 = arith.constant 0 : index
    %124 = vector.load %arg2[%c5, %c0_53, %c0_54, %c0_55] : memref<6x4x32x8xf32, #tpu.memory_space<vmem>>, vector<1x4x32x8xf32>
    %125 = vector.shape_cast %124 : vector<1x4x32x8xf32> to vector<4x32x8xf32>
    %126 = vector.shape_cast %125 : vector<4x32x8xf32> to vector<1x4x32x8xf32>
    %127 = vector.shape_cast %126 : vector<1x4x32x8xf32> to vector<1x4x32x8xf32>
    %128 = vector.broadcast %127 : vector<1x4x32x8xf32> to vector<2x4x32x8xf32>
    %129 = vector.shape_cast %128 : vector<2x4x32x8xf32> to vector<8x32x8xf32>
    %c3_56 = arith.constant 3 : index
    %c0_57 = arith.constant 0 : index
    %c0_58 = arith.constant 0 : index
    %130 = vector.load %arg3[%c3_56, %c0_57, %c0_58] : memref<6x4x8xf32, #tpu.memory_space<vmem>>, vector<1x4x8xf32>
    %131 = vector.shape_cast %130 : vector<1x4x8xf32> to vector<4x8xf32>
    %132 = vector.shape_cast %131 : vector<4x8xf32> to vector<1x4x8xf32>
    %133 = vector.shape_cast %132 : vector<1x4x8xf32> to vector<1x4x8xf32>
    %134 = vector.broadcast %133 : vector<1x4x8xf32> to vector<2x4x8xf32>
    %135 = vector.shape_cast %134 : vector<2x4x8xf32> to vector<8x8xf32>
    %136 = vector.shape_cast %135 : vector<8x8xf32> to vector<8x1x8xf32>
    %c4_59 = arith.constant 4 : index
    %c0_60 = arith.constant 0 : index
    %c0_61 = arith.constant 0 : index
    %137 = vector.load %arg3[%c4_59, %c0_60, %c0_61] : memref<6x4x8xf32, #tpu.memory_space<vmem>>, vector<1x4x8xf32>
    %138 = vector.shape_cast %137 : vector<1x4x8xf32> to vector<4x8xf32>
    %139 = vector.shape_cast %138 : vector<4x8xf32> to vector<1x4x8xf32>
    %140 = vector.shape_cast %139 : vector<1x4x8xf32> to vector<1x4x8xf32>
    %141 = vector.broadcast %140 : vector<1x4x8xf32> to vector<2x4x8xf32>
    %142 = vector.shape_cast %141 : vector<2x4x8xf32> to vector<8x8xf32>
    %143 = vector.shape_cast %142 : vector<8x8xf32> to vector<8x1x8xf32>
    %c5_62 = arith.constant 5 : index
    %c0_63 = arith.constant 0 : index
    %c0_64 = arith.constant 0 : index
    %144 = vector.load %arg3[%c5_62, %c0_63, %c0_64] : memref<6x4x8xf32, #tpu.memory_space<vmem>>, vector<1x4x8xf32>
    %145 = vector.shape_cast %144 : vector<1x4x8xf32> to vector<4x8xf32>
    %146 = vector.shape_cast %145 : vector<4x8xf32> to vector<1x4x8xf32>
    %147 = vector.shape_cast %146 : vector<1x4x8xf32> to vector<1x4x8xf32>
    %148 = vector.broadcast %147 : vector<1x4x8xf32> to vector<2x4x8xf32>
    %149 = vector.shape_cast %148 : vector<2x4x8xf32> to vector<8x8xf32>
    %150 = vector.shape_cast %149 : vector<8x8xf32> to vector<8x1x8xf32>
    %151 = vector.shape_cast %111 : vector<2x8x32xf32> to vector<2x1x8x32xf32>
    %152 = vector.shape_cast %151 : vector<2x1x8x32xf32> to vector<2x1x8x32xf32>
    %153 = vector.broadcast %152 : vector<2x1x8x32xf32> to vector<2x4x8x32xf32>
    %154 = vector.shape_cast %153 : vector<2x4x8x32xf32> to vector<8x8x32xf32>
    "tpu.trace_start"() <{level = 10 : i32, message = "gqd,gde->gqe"}> : () -> ()
    %cst_65 = arith.constant dense<0.000000e+00> : vector<8x8x8xf32>
    %155 = tpu.matmul %154, %117, %cst_65 {dimension_numbers = #tpu.dot_dimension_numbers<[2], [1], [1], [2], [0, 0, 0, 1, 1, 2], [0], [0]>} : vector<8x8x32xf32>, vector<8x32x8xf32>, vector<8x8x8xf32> -> vector<8x8x8xf32>
    "tpu.trace_stop"() : () -> ()
    %156 = vector.broadcast %136 : vector<8x1x8xf32> to vector<8x8x8xf32>
    %157 = arith.addf %155, %156 : vector<8x8x8xf32>
    "tpu.trace_start"() <{level = 10 : i32, message = "gkd,gde->gke"}> : () -> ()
    %cst_66 = arith.constant dense<0.000000e+00> : vector<8x8x8xf32>
    %158 = tpu.matmul %5, %123, %cst_66 {dimension_numbers = #tpu.dot_dimension_numbers<[2], [1], [1], [2], [0, 0, 0, 1, 1, 2], [0], [0]>} : vector<8x8x32xf32>, vector<8x32x8xf32>, vector<8x8x8xf32> -> vector<8x8x8xf32>
    "tpu.trace_stop"() : () -> ()
    %159 = vector.broadcast %143 : vector<8x1x8xf32> to vector<8x8x8xf32>
    %160 = arith.addf %158, %159 : vector<8x8x8xf32>
    "tpu.trace_start"() <{level = 10 : i32, message = "gkd,gde->gke"}> : () -> ()
    %cst_67 = arith.constant dense<0.000000e+00> : vector<8x8x8xf32>
    %161 = tpu.matmul %5, %129, %cst_67 {dimension_numbers = #tpu.dot_dimension_numbers<[2], [1], [1], [2], [0, 0, 0, 1, 1, 2], [0], [0]>} : vector<8x8x32xf32>, vector<8x32x8xf32>, vector<8x8x8xf32> -> vector<8x8x8xf32>
    "tpu.trace_stop"() : () -> ()
    %162 = vector.broadcast %150 : vector<8x1x8xf32> to vector<8x8x8xf32>
    %163 = arith.addf %161, %162 : vector<8x8x8xf32>
    "tpu.trace_start"() <{level = 10 : i32, message = "gqe,gke->gqk"}> : () -> ()
    %cst_68 = arith.constant dense<0.000000e+00> : vector<8x8x8xf32>
    %164 = tpu.matmul %157, %160, %cst_68 {dimension_numbers = #tpu.dot_dimension_numbers<[2], [2], [1], [1], [0, 0, 0, 1, 1, 1], [0], [0]>} : vector<8x8x8xf32>, vector<8x8x8xf32>, vector<8x8x8xf32> -> vector<8x8x8xf32>
    "tpu.trace_stop"() : () -> ()
    %cst_69 = arith.constant dense<0xFF800000> : vector<8x8xf32>
    %165 = vector.multi_reduction <maximumf>, %164, %cst_69 [2] : vector<8x8x8xf32> to vector<8x8xf32>
    %166 = vector.shape_cast %165 : vector<8x8xf32> to vector<8x8x1xf32>
    %167 = vector.broadcast %166 : vector<8x8x1xf32> to vector<8x8x8xf32>
    %168 = arith.subf %164, %167 : vector<8x8x8xf32>
    %169 = math.exp %168 : vector<8x8x8xf32>
    %cst_70 = arith.constant dense<0.000000e+00> : vector<8x8xf32>
    %170 = vector.multi_reduction <add>, %169, %cst_70 [2] : vector<8x8x8xf32> to vector<8x8xf32>
    %171 = vector.shape_cast %170 : vector<8x8xf32> to vector<8x8x1xf32>
    %172 = vector.broadcast %171 : vector<8x8x1xf32> to vector<8x8x8xf32>
    %173 = arith.divf %169, %172 : vector<8x8x8xf32>
    "tpu.trace_start"() <{level = 10 : i32, message = "gqk,gke->gqe"}> : () -> ()
    %cst_71 = arith.constant dense<0.000000e+00> : vector<8x8x8xf32>
    %174 = tpu.matmul %173, %163, %cst_71 {dimension_numbers = #tpu.dot_dimension_numbers<[2], [1], [1], [2], [0, 0, 0, 1, 1, 2], [0], [0]>} : vector<8x8x8xf32>, vector<8x8x8xf32>, vector<8x8x8xf32> -> vector<8x8x8xf32>
    "tpu.trace_stop"() : () -> ()
    %c1_72 = arith.constant 1 : index
    %c0_73 = arith.constant 0 : index
    %c0_74 = arith.constant 0 : index
    %c0_75 = arith.constant 0 : index
    %175 = vector.load %arg4[%c1_72, %c0_73, %c0_74, %c0_75] : memref<2x4x8x32xf32, #tpu.memory_space<vmem>>, vector<1x4x8x32xf32>
    %176 = vector.shape_cast %175 : vector<1x4x8x32xf32> to vector<4x8x32xf32>
    %177 = vector.shape_cast %176 : vector<4x8x32xf32> to vector<1x4x8x32xf32>
    %178 = vector.shape_cast %177 : vector<1x4x8x32xf32> to vector<1x4x8x32xf32>
    %179 = vector.broadcast %178 : vector<1x4x8x32xf32> to vector<2x4x8x32xf32>
    %180 = vector.shape_cast %179 : vector<2x4x8x32xf32> to vector<8x8x32xf32>
    "tpu.trace_start"() <{level = 10 : i32, message = "gqe,ged->gqd"}> : () -> ()
    %cst_76 = arith.constant dense<0.000000e+00> : vector<8x8x32xf32>
    %181 = tpu.matmul %174, %180, %cst_76 {dimension_numbers = #tpu.dot_dimension_numbers<[2], [1], [1], [2], [0, 0, 0, 1, 1, 2], [0], [0]>} : vector<8x8x8xf32>, vector<8x8x32xf32>, vector<8x8x32xf32> -> vector<8x8x32xf32>
    "tpu.trace_stop"() : () -> ()
    %182 = vector.shape_cast %181 : vector<8x8x32xf32> to vector<2x4x8x32xf32>
    %cst_77 = arith.constant dense<0.000000e+00> : vector<2x8x32xf32>
    %183 = vector.multi_reduction <add>, %182, %cst_77 [1] : vector<2x4x8x32xf32> to vector<2x8x32xf32>
    %c3_78 = arith.constant 3 : index
    %c0_79 = arith.constant 0 : index
    %184 = vector.load %arg6[%c3_78, %c0_79] : memref<9x32xf32, #tpu.memory_space<vmem>>, vector<1x32xf32>
    %185 = vector.shape_cast %184 : vector<1x32xf32> to vector<32xf32>
    %186 = vector.shape_cast %185 : vector<32xf32> to vector<1x1x32xf32>
    %187 = vector.broadcast %186 : vector<1x1x32xf32> to vector<2x8x32xf32>
    %188 = arith.addf %183, %187 : vector<2x8x32xf32>
    %189 = arith.addf %111, %188 : vector<2x8x32xf32>
    %c4_80 = arith.constant 4 : index
    %c0_81 = arith.constant 0 : index
    %190 = vector.load %arg6[%c4_80, %c0_81] : memref<9x32xf32, #tpu.memory_space<vmem>>, vector<1x32xf32>
    %191 = vector.shape_cast %190 : vector<1x32xf32> to vector<32xf32>
    %c5_82 = arith.constant 5 : index
    %c0_83 = arith.constant 0 : index
    %192 = vector.load %arg6[%c5_82, %c0_83] : memref<9x32xf32, #tpu.memory_space<vmem>>, vector<1x32xf32>
    %193 = vector.shape_cast %192 : vector<1x32xf32> to vector<32xf32>
    %cst_84 = arith.constant dense<0.000000e+00> : vector<2x8xf32>
    %194 = vector.multi_reduction <add>, %189, %cst_84 [2] : vector<2x8x32xf32> to vector<2x8xf32>
    %195 = vector.shape_cast %194 : vector<2x8xf32> to vector<2x8x1xf32>
    %cst_85 = arith.constant 3.200000e+01 : f32
    %196 = vector.broadcast %cst_85 : f32 to vector<2x8x1xf32>
    %197 = arith.divf %195, %196 : vector<2x8x1xf32>
    %198 = vector.broadcast %197 : vector<2x8x1xf32> to vector<2x8x32xf32>
    %199 = arith.subf %189, %198 : vector<2x8x32xf32>
    %200 = arith.mulf %199, %199 : vector<2x8x32xf32>
    %cst_86 = arith.constant dense<0.000000e+00> : vector<2x8xf32>
    %201 = vector.multi_reduction <add>, %200, %cst_86 [2] : vector<2x8x32xf32> to vector<2x8xf32>
    %202 = vector.shape_cast %201 : vector<2x8xf32> to vector<2x8x1xf32>
    %cst_87 = arith.constant 3.200000e+01 : f32
    %203 = vector.broadcast %cst_87 : f32 to vector<2x8x1xf32>
    %204 = arith.divf %202, %203 : vector<2x8x1xf32>
    %205 = vector.broadcast %197 : vector<2x8x1xf32> to vector<2x8x32xf32>
    %206 = arith.subf %189, %205 : vector<2x8x32xf32>
    %cst_88 = arith.constant 9.99999974E-6 : f32
    %207 = vector.broadcast %cst_88 : f32 to vector<2x8x1xf32>
    %208 = arith.addf %204, %207 : vector<2x8x1xf32>
    %209 = math.rsqrt %208 : vector<2x8x1xf32>
    %210 = vector.broadcast %209 : vector<2x8x1xf32> to vector<2x8x32xf32>
    %211 = arith.mulf %206, %210 : vector<2x8x32xf32>
    %212 = vector.shape_cast %191 : vector<32xf32> to vector<1x1x32xf32>
    %213 = vector.broadcast %212 : vector<1x1x32xf32> to vector<2x8x32xf32>
    %214 = arith.mulf %211, %213 : vector<2x8x32xf32>
    %215 = vector.shape_cast %193 : vector<32xf32> to vector<1x1x32xf32>
    %216 = vector.broadcast %215 : vector<1x1x32xf32> to vector<2x8x32xf32>
    %217 = arith.addf %214, %216 : vector<2x8x32xf32>
    %218 = vector.shape_cast %217 : vector<2x8x32xf32> to vector<16x32xf32>
    %c0_89 = arith.constant 0 : index
    %c0_90 = arith.constant 0 : index
    %219 = vector.load %arg5[%c0_89, %c0_90] : memref<32x32xf32, #tpu.memory_space<vmem>>, vector<32x32xf32>
    %cst_91 = arith.constant dense<0.000000e+00> : vector<16x32xf32>
    %220 = tpu.matmul %218, %219, %cst_91 {dimension_numbers = #tpu.dot_dimension_numbers<[1], [0], [0], [1], [0, 0, 1, 1], [], []>} : vector<16x32xf32>, vector<32x32xf32>, vector<16x32xf32> -> vector<16x32xf32>
    %221 = vector.shape_cast %220 : vector<16x32xf32> to vector<2x8x32xf32>
    %c6 = arith.constant 6 : index
    %c0_92 = arith.constant 0 : index
    %222 = vector.load %arg6[%c6, %c0_92] : memref<9x32xf32, #tpu.memory_space<vmem>>, vector<1x32xf32>
    %223 = vector.shape_cast %222 : vector<1x32xf32> to vector<32xf32>
    %224 = vector.shape_cast %223 : vector<32xf32> to vector<1x1x32xf32>
    %225 = vector.broadcast %224 : vector<1x1x32xf32> to vector<2x8x32xf32>
    %226 = arith.addf %221, %225 : vector<2x8x32xf32>
    %227 = arith.addf %226, %0 : vector<2x8x32xf32>
    %c7 = arith.constant 7 : index
    %c0_93 = arith.constant 0 : index
    %228 = vector.load %arg6[%c7, %c0_93] : memref<9x32xf32, #tpu.memory_space<vmem>>, vector<1x32xf32>
    %229 = vector.shape_cast %228 : vector<1x32xf32> to vector<32xf32>
    %c8 = arith.constant 8 : index
    %c0_94 = arith.constant 0 : index
    %230 = vector.load %arg6[%c8, %c0_94] : memref<9x32xf32, #tpu.memory_space<vmem>>, vector<1x32xf32>
    %231 = vector.shape_cast %230 : vector<1x32xf32> to vector<32xf32>
    %cst_95 = arith.constant dense<0.000000e+00> : vector<2x8xf32>
    %232 = vector.multi_reduction <add>, %227, %cst_95 [2] : vector<2x8x32xf32> to vector<2x8xf32>
    %233 = vector.shape_cast %232 : vector<2x8xf32> to vector<2x8x1xf32>
    %cst_96 = arith.constant 3.200000e+01 : f32
    %234 = vector.broadcast %cst_96 : f32 to vector<2x8x1xf32>
    %235 = arith.divf %233, %234 : vector<2x8x1xf32>
    %236 = vector.broadcast %235 : vector<2x8x1xf32> to vector<2x8x32xf32>
    %237 = arith.subf %227, %236 : vector<2x8x32xf32>
    %238 = arith.mulf %237, %237 : vector<2x8x32xf32>
    %cst_97 = arith.constant dense<0.000000e+00> : vector<2x8xf32>
    %239 = vector.multi_reduction <add>, %238, %cst_97 [2] : vector<2x8x32xf32> to vector<2x8xf32>
    %240 = vector.shape_cast %239 : vector<2x8xf32> to vector<2x8x1xf32>
    %cst_98 = arith.constant 3.200000e+01 : f32
    %241 = vector.broadcast %cst_98 : f32 to vector<2x8x1xf32>
    %242 = arith.divf %240, %241 : vector<2x8x1xf32>
    %243 = vector.broadcast %235 : vector<2x8x1xf32> to vector<2x8x32xf32>
    %244 = arith.subf %227, %243 : vector<2x8x32xf32>
    %cst_99 = arith.constant 9.99999974E-6 : f32
    %245 = vector.broadcast %cst_99 : f32 to vector<2x8x1xf32>
    %246 = arith.addf %242, %245 : vector<2x8x1xf32>
    %247 = math.rsqrt %246 : vector<2x8x1xf32>
    %248 = vector.broadcast %247 : vector<2x8x1xf32> to vector<2x8x32xf32>
    %249 = arith.mulf %244, %248 : vector<2x8x32xf32>
    %250 = vector.shape_cast %229 : vector<32xf32> to vector<1x1x32xf32>
    %251 = vector.broadcast %250 : vector<1x1x32xf32> to vector<2x8x32xf32>
    %252 = arith.mulf %249, %251 : vector<2x8x32xf32>
    %253 = vector.shape_cast %231 : vector<32xf32> to vector<1x1x32xf32>
    %254 = vector.broadcast %253 : vector<1x1x32xf32> to vector<2x8x32xf32>
    %255 = arith.addf %252, %254 : vector<2x8x32xf32>
    %c0_100 = arith.constant 0 : index
    %c0_101 = arith.constant 0 : index
    %c0_102 = arith.constant 0 : index
    %256 = vector.load %arg7[%c0_100, %c0_101, %c0_102] : memref<2x8x32xf32, #tpu.memory_space<vmem>>, vector<2x8x32xf32>
    tpu.vector_store %arg7[%c0_100, %c0_101, %c0_102], %255 {strides = array<i32>} : memref<2x8x32xf32, #tpu.memory_space<vmem>>, vector<2x8x32xf32>,
    return
  }
}

</mosaic_0001>

<bundles_post_ra>
// kernel: tpu_custom_call.1
= control target key start
LH: loop header
LB: loop body
LE: loop exit
PB: predicated region body
PF: predicated region fallthrough
CT: control target
= control target key end

     0   :  { %v9557_v3 = vmov 0.0|0.0   ;;  %vm9558_vm0 = vmmov 0   ;;  %v9559_v11 = vmov 0.0   ;;  %vm181_vm1 = vcmask 261120   ;;  %s10692_s0 = inlined_call_operand.vmem [shape: f32[2,8,32], index: 0, kind: input, shape index: {}]   ;;  %s10693_s1 = inlined_call_operand.vmem [shape: f32[2,8,32], index: 1, kind: input, shape index: {}]   ;;  %s10694_s2 = inlined_call_operand.vmem [shape: f32[6,4,32,8], index: 2, kind: input, shape index: {}]   ;;  %s10695_s3 = inlined_call_operand.vmem [shape: f32[6,4,8], index: 3, kind: input, shape index: {}]   ;;  %s10696_s4 = inlined_call_operand.vmem [shape: f32[2,4,8,32], index: 4, kind: input, shape index: {}]   ;;  %s10697_s5 = inlined_call_operand.vmem [shape: f32[32,32], index: 5, kind: input, shape index: {}]   ;;  %s10698_s6 = inlined_call_operand.vmem [shape: f32[9,32], index: 6, kind: input, shape index: {}]   ;;  %s10699_s7 = inlined_call_operand.hbm [shape: f32[2,8,32], index: 7, kind: output, shape index: {}]  }
   0x1   :  { %v31_v0 = vld [vmem:[%s10694_s2] sm:$0xff]  ;;  %v32_v1 = vld [vmem:[%s10694_s2 + $0x8] sm:$0xff]  ;;  %9148 = vmatprep.subr.bf16.mxu0 %v9557_v3  ;;  %9154 = vmatprep.subr.bf16.mxu1 %v9557_v3  ;;  %v33_v6 = vld [vmem:[%s10694_s2 + $0x10] sm:$0xff] }
   0x2   :  { %v35_v2 = vld [vmem:[%s10694_s2 + $0x20] sm:$0xff]  ;;  %v9149_v4 = vpack.c.bf16 %v32_v1, %v31_v0  ;;  %v36_v5 = vld [vmem:[%s10694_s2 + $0x28] sm:$0xff]  ;;  %v34_v7 = vld [vmem:[%s10694_s2 + $0x18] sm:$0xff]  ;;  %8377 = vmatprep.mubr.msk.f32.mxu0 %vm9558_vm0, %v9559_v11  ;;  %8388 = vmatprep.mubr.msk.f32.mxu1 %vm9558_vm0, %v9559_v11 }
   0x3   :  { %v9155_v8 = vpack.c.bf16 %v36_v5, %v35_v2  ;;  %v37_v9 = vld [vmem:[%s10694_s2 + $0x30] sm:$0xff]  ;;  %v38_v10 = vld [vmem:[%s10694_s2 + $0x38] sm:$0xff]  ;;  %v9152_v12 = vpack.c.bf16 %v34_v7, %v33_v6  ;;  %v39_v14 = vld [vmem:[%s10694_s2 + $0x40] sm:$0xff] }
   0x4   :  { %9150 = vmatpush3.bf16.msra.mxu0 %v9149_v4  ;;  %v9158_v13 = vpack.c.bf16 %v38_v10, %v37_v9  ;;  %v40_v15 = vld [vmem:[%s10694_s2 + $0x48] sm:$0xff]  ;;  %v43_v16 = vld [vmem:[%s10694_s2 + $0x60] sm:$0xff]  ;;  %v41_v21 = vld [vmem:[%s10694_s2 + $0x50] sm:$0xff] }
   0x5   :  { %9156 = vmatpush3.bf16.msra.mxu1 %v9155_v8  ;;  %9151 = vmatprep.subr.bf16.mxu0 %v9557_v3  ;;  %v44_v17 = vld [vmem:[%s10694_s2 + $0x68] sm:$0xff]  ;;  %v27_v18 = vld [vmem:[%s10692_s0] sm:$0xff]  ;;  %v9161_v19 = vpack.c.bf16 %v40_v15, %v39_v14  ;;  %v42_v22 = vld [vmem:[%s10694_s2 + $0x58] sm:$0xff] }
   0x6   :  { %9157 = vmatprep.subr.bf16.mxu1 %v9557_v3  ;;  %v9167_v20 = vpack.c.bf16 %v44_v17, %v43_v16  ;;  %v45_v23 = vld [vmem:[%s10694_s2 + $0x70] sm:$0xff]  ;;  %v46_v24 = vld [vmem:[%s10694_s2 + $0x78] sm:$0xff]  ;;  %v9164_v25 = vpack.c.bf16 %v42_v22, %v41_v21 }
   0x7   :  { %v9170_v26 = vpack.c.bf16 %v46_v24, %v45_v23 }
   0x8   :  { %9153 = vmatpush3.bf16.msra.mxu0 %v9152_v12 }
   0x9   :  { %9159 = vmatpush3.bf16.msra.mxu1 %v9158_v13  ;;  %9160 = vmatprep.subr.bf16.mxu0 %v9557_v3 }
   0xa   :  { %9166 = vmatprep.subr.bf16.mxu1 %v9557_v3 }
   0xb   :  { %8378 = vmatmul.mubr.msk.f32.vlgmr.msra.gmra.mrb[0].mxu0 %vm181_vm1, %v27_v18 }
   0xc   :  { %8389 = vmatmul.mubr.msk.f32.vlgmr.msra.gmra.mrb[0].mxu1 %vm181_vm1, %v27_v18  ;;  %9162 = vmatpush3.bf16.msra.mxu0 %v9161_v19 }
   0xd   :  { %9168 = vmatpush3.bf16.msra.mxu1 %v9167_v20  ;;  %9163 = vmatprep.subr.bf16.mxu0 %v9557_v3 }
   0xe   :  { %9169 = vmatprep.subr.bf16.mxu1 %v9557_v3  ;;  %8399 = vmatprep.mubr.msk.f32.mxu0 %vm9558_vm0, %v9559_v11 }
   0xf   :  { %12 = vsyncpa [#allocation3], 0  ;;  %8410 = vmatprep.mubr.msk.f32.mxu1 %vm9558_vm0, %v9559_v11  ;;  %v28_v27 = vld [vmem:[%s10692_s0 + $0x8] sm:$0xff]  ;;  %v7809_v28 = vld [vmem:[%s10694_s2 + $0x80] sm:$0xff]  ;;  %v9560_v24 = vmov 1966171168  }
  0x10   :  { %9165 = vmatpush3.bf16.msra.mxu0 %v9164_v25  ;;  %v7810_v29 = vld [vmem:[%s10694_s2 + $0x88] sm:$0xff]  ;;  %v7813_v30 = vld [vmem:[%s10694_s2 + $0xa0] sm:$0xff]  ;;  %v7811_v34 = vld [vmem:[%s10694_s2 + $0x90] sm:$0xff]  ;;  %vm1914_vm2 = vcmask 64512   ;;  %s9561_s27 = smov [#allocation2]  }
  0x11   :  { %9171 = vmatpush3.bf16.msra.mxu1 %v9170_v26  ;;  %9172 = vmatprep.subr.bf16.mxu0 %v9557_v3  ;;  %v7814_v31 = vld [vmem:[%s10694_s2 + $0xa8] sm:$0xff]  ;;  %v9197_v32 = vpack.c.bf16 %v7810_v29, %v7809_v28  ;;  %v7812_v35 = vld [vmem:[%s10694_s2 + $0x98] sm:$0xff]  ;;  %v7815_v36 = vld [vmem:[%s10694_s2 + $0xb0] sm:$0xff]  ;;  %s7798_s28 = sshll.u32 %s9561_s27, 4  ;;  %s7799_s28 = int_to_ptr.vmem [resolvable:$true] %s7798_s28 }
  0x12   :  { %9178 = vmatprep.subr.bf16.mxu1 %v9557_v3  ;;  %v9203_v33 = vpack.c.bf16 %v7814_v31, %v7813_v30  ;;  %v7816_v37 = vld [vmem:[%s10694_s2 + $0xb8] sm:$0xff]  ;;  %v9200_v38 = vpack.c.bf16 %v7812_v35, %v7811_v34  ;;  %v7817_v40 = vld [vmem:[%s10694_s2 + $0xc0] sm:$0xff]  ;;  %v7818_v41 = vld [vmem:[%s10694_s2 + $0xc8] sm:$0xff]  ;;  %s9533_s29 = scalar_lea.vmem %s7799_s28, 256  ;;  %p9538_p1 = scmp.lt.s32.totalorder %s7799_s28, %s7799_s28 }
  0x13   :  { %8400 = vmatmul.mubr.msk.f32.vlgmr.msra.gmra.mrb[2].mxu0 %vm181_vm1, %v27_v18  ;;  %v9206_v39 = vpack.c.bf16 %v7816_v37, %v7815_v36  ;;  %v7821_v42 = vld [vmem:[%s10694_s2 + $0xe0] sm:$0xff]  ;;  %v7822_v43 = vld [vmem:[%s10694_s2 + $0xe8] sm:$0xff]  ;;  %v9209_v45 = vpack.c.bf16 %v7818_v41, %v7817_v40  ;;  %v7819_v47 = vld [vmem:[%s10694_s2 + $0xd0] sm:$0xff]  ;;  %p9534_p0 = scmp.ne.s32.totalorder %s7799_s28, %s9533_s29  ;;  %p9539_p2 = scmp.lt.s32.totalorder %s9533_s29, %s9533_s29 }
  0x14   :  { %8411 = vmatmul.mubr.msk.f32.vlgmr.msra.gmra.mrb[2].mxu1 %vm181_vm1, %v27_v18  ;;  %9174 = vmatpush3.bf16.msra.mxu0 %v9149_v4  ;;  %v9745_v44 = vld [vmem:[%s10693_s1] sm:$0xff]  ;;  %v9215_v46 = vpack.c.bf16 %v7822_v43, %v7821_v42  ;;  %v7820_v48 = vld [vmem:[%s10694_s2 + $0xd8] sm:$0xff]  ;;  %v7823_v49 = vld [vmem:[%s10694_s2 + $0xf0] sm:$0xff] }
  0x15   :  { %9180 = vmatpush3.bf16.msra.mxu1 %v9155_v8  ;;  %9175 = vmatprep.subr.bf16.mxu0 %v9557_v3  ;;  %v7824_v50 = vld [vmem:[%s10694_s2 + $0xf8] sm:$0xff]  ;;  %v9212_v51 = vpack.c.bf16 %v7820_v48, %v7819_v47  ;;  %v9786_v53 = vld [vmem:[%s10693_s1 + $0x8] sm:$0xff]  ;;  %v7829_v54 = vld [vmem:[%s10694_s2 + $0x120] sm:$0xff]  ;;  %p9540_p3 = por %p9539_p2, %p9538_p1 }
  0x16   :  { %9181 = vmatprep.subr.bf16.mxu1 %v9557_v3  ;;  %8421 = vmatprep.mubr.msk.f32.mxu0 %vm9558_vm0, %v9559_v11  ;;  %v9218_v52 = vpack.c.bf16 %v7824_v50, %v7823_v49  ;;  %v7830_v55 = vld [vmem:[%s10694_s2 + $0x128] sm:$0xff]  ;;  %v7831_v57 = vld [vmem:[%s10694_s2 + $0x130] sm:$0xff]  ;;  %v7832_v58 = vld [vmem:[%s10694_s2 + $0x138] sm:$0xff] }
  0x17   :  { %8432 = vmatprep.mubr.msk.f32.mxu1 %vm9558_vm0, %v9559_v11  ;;  %v9251_v56 = vpack.c.bf16 %v7830_v55, %v7829_v54  ;;  %v9254_v59 = vpack.c.bf16 %v7832_v58, %v7831_v57  ;;  %v7825_v60 = vld [vmem:[%s10694_s2 + $0x100] sm:$0xff]  ;;  %v7826_v61 = vld [vmem:[%s10694_s2 + $0x108] sm:$0xff]  ;;  %v7827_v2 = vld [vmem:[%s10694_s2 + $0x110] sm:$0xff]  ;;  %p9541_p4 = pnand %p9540_p3, %p9534_p0 }
  0x18   :  { %9177 = vmatpush3.bf16.msra.mxu0 %v9152_v12  ;;  %v7837_v62 = vld [vmem:[%s10694_s2 + $0x160] sm:$0xff]  ;;  %v9245_v63 = vpack.c.bf16 %v7826_v61, %v7825_v60  ;;  %v7838_v0 = vld [vmem:[%s10694_s2 + $0x168] sm:$0xff]  ;;  %v7828_v4 = vld [vmem:[%s10694_s2 + $0x118] sm:$0xff] }
  0x19   :  { %9183 = vmatpush3.bf16.msra.mxu1 %v9158_v13  ;;  %9184 = vmatprep.subr.bf16.mxu0 %v9557_v3  ;;  %v9263_v1 = vpack.c.bf16 %v7838_v0, %v7837_v62  ;;  %v7839_v5 = vld [vmem:[%s10694_s2 + $0x170] sm:$0xff]  ;;  %v9248_v6 = vpack.c.bf16 %v7828_v4, %v7827_v2  ;;  %v7840_v7 = vld [vmem:[%s10694_s2 + $0x178] sm:$0xff]  ;;  %v7833_v9 = vld [vmem:[%s10694_s2 + $0x140] sm:$0xff] }
  0x1a   :  { %9190 = vmatprep.subr.bf16.mxu1 %v9557_v3  ;;  %v9266_v8 = vpack.c.bf16 %v7840_v7, %v7839_v5  ;;  %v7834_v10 = vld [vmem:[%s10694_s2 + $0x148] sm:$0xff]  ;;  %v7835_v13 = vld [vmem:[%s10694_s2 + $0x150] sm:$0xff]  ;;  %v7836_v14 = vld [vmem:[%s10694_s2 + $0x158] sm:$0xff] }
  0x1b   :  { %8422 = vmatmul.mubr.msk.f32.vlgmr.msra.gmra.mrb[4].mxu0 %vm181_vm1, %v28_v27  ;;  %v9257_v12 = vpack.c.bf16 %v7834_v10, %v7833_v9  ;;  %v9260_v15 = vpack.c.bf16 %v7836_v14, %v7835_v13  ;;  %v7841_v37 = vld.sshfl [vmem:[%s10695_s3] sm:$0x33 pattern:$0x75316420] }
  0x1c   :  { %8433 = vmatmul.mubr.msk.f32.vlgmr.msra.gmra.mrb[4].mxu1 %vm181_vm1, %v28_v27  ;;  %9186 = vmatpush3.bf16.msra.mxu0 %v9161_v19 }
  0x1d   :  { %9192 = vmatpush3.bf16.msra.mxu1 %v9167_v20  ;;  %9187 = vmatprep.subr.bf16.mxu0 %v9557_v3 }
  0x1e   :  { %9193 = vmatprep.subr.bf16.mxu1 %v9557_v3  ;;  %8443 = vmatprep.mubr.msk.f32.mxu0 %vm9558_vm0, %v9559_v11 }
  0x1f   :  { %8454 = vmatprep.mubr.msk.f32.mxu1 %vm9558_vm0, %v9559_v11 }
  0x20   :  { %9189 = vmatpush3.bf16.msra.mxu0 %v9164_v25  ;;  %v92_v25 = vunpack.c.l.s4 %v9560_v24 }
  0x21   :  { %9195 = vmatpush3.bf16.msra.mxu1 %v9170_v26  ;;  %9196 = vmatprep.subr.bf16.mxu0 %v9557_v3  ;;  %v94_v26 = vlaneseq }
  0x22   :  { %9202 = vmatprep.subr.bf16.mxu1 %v9557_v3  ;;  %v93_v31 = vunpack.c.0.s8 %v92_v25 }
  0x23   :  { %8444 = vmatmul.mubr.msk.f32.vlgmr.msra.gmra.mrb[6].mxu0 %vm181_vm1, %v28_v27 }
  0x24   :  { %8455 = vmatmul.mubr.msk.f32.vlgmr.msra.gmra.mrb[6].mxu1 %vm181_vm1, %v28_v27  ;;  %9198 = vmatpush3.bf16.msra.mxu0 %v9197_v32 }
  0x25   :  { %9204 = vmatpush3.bf16.msra.mxu1 %v9203_v33  ;;  %9199 = vmatprep.subr.bf16.mxu0 %v9557_v3 }
  0x26   :  { %9205 = vmatprep.subr.bf16.mxu1 %v9557_v3  ;;  %8465 = vmatprep.mubr.msk.f32.mxu0 %vm9558_vm0, %v9559_v11 }
  0x27   :  { %8476 = vmatprep.mubr.msk.f32.mxu1 %vm9558_vm0, %v9559_v11 }
  0x28   :  { %9201 = vmatpush3.bf16.msra.mxu0 %v9200_v38 }
  0x29   :  { %9207 = vmatpush3.bf16.msra.mxu1 %v9206_v39  ;;  %9208 = vmatprep.subr.bf16.mxu0 %v9557_v3 }
  0x2a   :  { %9214 = vmatprep.subr.bf16.mxu1 %v9557_v3 }
  0x2b   :  { %8466 = vmatmul.mubr.msk.f32.vlgmr.msra.gmra.mrb[8].mxu0 %vm181_vm1, %v9745_v44 }
  0x2c   :  { %8477 = vmatmul.mubr.msk.f32.vlgmr.msra.gmra.mrb[8].mxu1 %vm181_vm1, %v9745_v44  ;;  %9210 = vmatpush3.bf16.msra.mxu0 %v9209_v45 }
  0x2d   :  { %9216 = vmatpush3.bf16.msra.mxu1 %v9215_v46  ;;  %9211 = vmatprep.subr.bf16.mxu0 %v9557_v3 }
  0x2e   :  { %9217 = vmatprep.subr.bf16.mxu1 %v9557_v3  ;;  %8487 = vmatprep.mubr.msk.f32.mxu0 %vm9558_vm0, %v9559_v11 }
  0x2f   :  { %8498 = vmatprep.mubr.msk.f32.mxu1 %vm9558_vm0, %v9559_v11 }
  0x30   :  { %9213 = vmatpush3.bf16.msra.mxu0 %v9212_v51 }
  0x31   :  { %9219 = vmatpush3.bf16.msra.mxu1 %v9218_v52  ;;  %9220 = vmatprep.subr.bf16.mxu0 %v9557_v3 }
  0x32   :  { %9226 = vmatprep.subr.bf16.mxu1 %v9557_v3 }
  0x33   :  { %8488 = vmatmul.mubr.msk.f32.vlgmr.msra.gmra.mrb[10].mxu0 %vm181_vm1, %v9745_v44 }
  0x34   :  { %8499 = vmatmul.mubr.msk.f32.vlgmr.msra.gmra.mrb[10].mxu1 %vm181_vm1, %v9745_v44  ;;  %9222 = vmatpush3.bf16.msra.mxu0 %v9197_v32  ;;  %v95_v32 = vshrl.u32 %v94_v26, 7 }
  0x35   :  { %9228 = vmatpush3.bf16.msra.mxu1 %v9203_v33  ;;  %9223 = vmatprep.subr.bf16.mxu0 %v9557_v3  ;;  %v7843_v33 = vld.sshfl [vmem:[%s10695_s3 + $0x4] sm:$0x33 pattern:$0x75316420] }
  0x36   :  { %9229 = vmatprep.subr.bf16.mxu1 %v9557_v3  ;;  %8509 = vmatprep.mubr.msk.f32.mxu0 %vm9558_vm0, %v9559_v11  ;;  %v9917_v34 = vsub.s32 %v93_v31, %v95_v32  ;;  %v117_v35 = vcombine.high %v7843_v33, %v7843_v33  ;;  %v9927_v42 = vsub.s32 0, %v95_v32 }
  0x37   :  { %8520 = vmatprep.mubr.msk.f32.mxu1 %vm9558_vm0, %v9559_v11 }
  0x38   :  { %9225 = vmatpush3.bf16.msra.mxu0 %v9200_v38  ;;  %v124_v40 = vrot.slane %v7843_v33, %v9917_v34  ;;  %v131_v43 = vrot.slane %v117_v35, %v9917_v34 }
  0x39   :  { %9231 = vmatpush3.bf16.msra.mxu1 %v9206_v39  ;;  %9232 = vmatprep.subr.bf16.mxu0 %v9557_v3 }
  0x3a   :  { %9238 = vmatprep.subr.bf16.mxu1 %v9557_v3  ;;  %v755_v47 = vrot.slane %v131_v43, %v9927_v42  ;;  %v132_v54 = vcombine.high %v124_v40, %v124_v40 }
  0x3b   :  { %8510 = vmatmul.mubr.msk.f32.vlgmr.msra.gmra.mrb[12].mxu0 %vm181_vm1, %v9786_v53 }
  0x3c   :  { %8521 = vmatmul.mubr.msk.f32.vlgmr.msra.gmra.mrb[12].mxu1 %vm181_vm1, %v9786_v53  ;;  %9234 = vmatpush3.bf16.msra.mxu0 %v9209_v45  ;;  %v90_v45 = vcombine.high %v7841_v37, %v7841_v37  ;;  %v759_v62 = vrot.slane %v132_v54, %v9927_v42 }
  0x3d   :  { %9240 = vmatpush3.bf16.msra.mxu1 %v9215_v46  ;;  %9235 = vmatprep.subr.bf16.mxu0 %v9557_v3  ;;  %v751_v46 = vrot.slane %v124_v40, %v9927_v42 }
  0x3e   :  { %9241 = vmatprep.subr.bf16.mxu1 %v9557_v3  ;;  %8531 = vmatprep.mubr.msk.f32.mxu0 %vm9558_vm0, %v9559_v11  ;;  %v104_v49 = vrot.slane %v90_v45, %v9917_v34 }
  0x3f   :  { %8542 = vmatprep.mubr.msk.f32.mxu1 %vm9558_vm0, %v9559_v11 }
  0x40   :  { %9237 = vmatpush3.bf16.msra.mxu0 %v9212_v51  ;;  %v106_v61 = vcombine.high %v104_v49, %v104_v49 }
  0x41   :  { %9243 = vmatpush3.bf16.msra.mxu1 %v9218_v52  ;;  %9244 = vmatprep.subr.bf16.mxu0 %v9557_v3 }
  0x42   :  { %9250 = vmatprep.subr.bf16.mxu1 %v9557_v3  ;;  %v176_v4 = vrot.slane %v106_v61, %v9927_v42 }
  0x43   :  { %8532 = vmatmul.mubr.msk.f32.vlgmr.msra.gmra.mrb[14].mxu0 %vm181_vm1, %v9786_v53 }
  0x44   :  { %8543 = vmatmul.mubr.msk.f32.vlgmr.msra.gmra.mrb[14].mxu1 %vm181_vm1, %v9786_v53  ;;  %8553 = vmatprep.mubr.msk.f32.mxu0 %vm9558_vm0, %v9559_v11 }
  0x45   :  { %9252 = vmatpush3.bf16.msra.mxu1 %v9251_v56  ;;  %8564 = vmatprep.mubr.msk.f32.mxu1 %vm9558_vm0, %v9559_v11 }
  0x46   :  { %9253 = vmatprep.subr.bf16.mxu1 %v9557_v3  ;;  %9246 = vmatpush3.bf16.msra.mxu0 %v9245_v63 }
  0x47   :  { %9247 = vmatprep.subr.bf16.mxu0 %v9557_v3 }
  0x49   :  { %9255 = vmatpush3.bf16.msra.mxu1 %v9254_v59 }
  0x4a   :  { %9262 = vmatprep.subr.bf16.mxu1 %v9557_v3  ;;  %9249 = vmatpush3.bf16.msra.mxu0 %v9248_v6 }
  0x4b   :  { %9256 = vmatprep.subr.bf16.mxu0 %v9557_v3 }
  0x4c   :  { %8565 = vmatmul.mubr.msk.f32.vlgmr.msra.gmra.mrb[16].mxu1 %vm181_vm1, %v9745_v44 }
  0x4d   :  { %9264 = vmatpush3.bf16.msra.mxu1 %v9263_v1  ;;  %8586 = vmatprep.mubr.msk.f32.mxu1 %vm9558_vm0, %v9559_v11 }
  0x4e   :  { %9265 = vmatprep.subr.bf16.mxu1 %v9557_v3  ;;  %8554 = vmatmul.mubr.msk.f32.vlgmr.msra.gmra.mrb[16].mxu0 %vm181_vm1, %v9745_v44 }
  0x4f   :  { %9258 = vmatpush3.bf16.msra.mxu0 %v9257_v12  ;;  %8575 = vmatprep.mubr.msk.f32.mxu0 %vm9558_vm0, %v9559_v11 }
  0x50   :  { %9259 = vmatprep.subr.bf16.mxu0 %v9557_v3 }
  0x51   :  { %9267 = vmatpush3.bf16.msra.mxu1 %v9266_v8 }
  0x52   :  { %9274 = vmatprep.subr.bf16.mxu1 %v9557_v3 }
  0x53   :  { %9261 = vmatpush3.bf16.msra.mxu0 %v9260_v15 }
  0x54   :  { %8587 = vmatmul.mubr.msk.f32.vlgmr.msra.gmra.mrb[18].mxu1 %vm181_vm1, %v9745_v44  ;;  %9268 = vmatprep.subr.bf16.mxu0 %v9557_v3 }
  0x55   :  { %9276 = vmatpush3.bf16.msra.mxu1 %v9251_v56  ;;  %8608 = vmatprep.mubr.msk.f32.mxu1 %vm9558_vm0, %v9559_v11  ;;  %v133_v56 = vcombine.high %v131_v43, %v131_v43 }
  0x56   :  { %9277 = vmatprep.subr.bf16.mxu1 %v9557_v3  ;;  %8576 = vmatmul.mubr.msk.f32.vlgmr.msra.gmra.mrb[18].mxu0 %vm181_vm1, %v9745_v44  ;;  %v97_v44 = vrot.slane %v7841_v37, %v9917_v34 }
  0x57   :  { %9270 = vmatpush3.bf16.msra.mxu0 %v9245_v63  ;;  %8597 = vmatprep.mubr.msk.f32.mxu0 %vm9558_vm0, %v9559_v11  ;;  %v763_v63 = vrot.slane %v133_v56, %v9927_v42 }
  0x58   :  { %9271 = vmatprep.subr.bf16.mxu0 %v9557_v3  ;;  %v164_v48 = vrot.slane %v97_v44, %v9927_v42  ;;  %v105_v60 = vcombine.high %v97_v44, %v97_v44 }
  0x59   :  { %9279 = vmatpush3.bf16.msra.mxu1 %v9254_v59  ;;  %v168_v59 = vrot.slane %v104_v49, %v9927_v42 }
  0x5a   :  { %9286 = vmatprep.subr.bf16.mxu1 %v9557_v3 }
  0x5b   :  { %9273 = vmatpush3.bf16.msra.mxu0 %v9248_v6 }
  0x5c   :  { %8609 = vmatmul.mubr.msk.f32.vlgmr.msra.gmra.mrb[20].mxu1 %vm181_vm1, %v9786_v53  ;;  %9280 = vmatprep.subr.bf16.mxu0 %v9557_v3 }
  0x5d   :  { %9288 = vmatpush3.bf16.msra.mxu1 %v9263_v1  ;;  %8630 = vmatprep.mubr.msk.f32.mxu1 %vm9558_vm0, %v9559_v11  ;;  %v172_v1 = vrot.slane %v105_v60, %v9927_v42 }
  0x5e   :  { %9289 = vmatprep.subr.bf16.mxu1 %v9557_v3  ;;  %8598 = vmatmul.mubr.msk.f32.vlgmr.msra.gmra.mrb[20].mxu0 %vm181_vm1, %v9786_v53 }
  0x5f   :  { %9282 = vmatpush3.bf16.msra.mxu0 %v9257_v12  ;;  %8619 = vmatprep.mubr.msk.f32.mxu0 %vm9558_vm0, %v9559_v11 }
  0x60   :  { %9283 = vmatprep.subr.bf16.mxu0 %v9557_v3 }
  0x61   :  { %9291 = vmatpush3.bf16.msra.mxu1 %v9266_v8 }
  0x62   :  { %8633 = vmatprep.subr.mxu1 %v9559_v11 }
  0x63   :  { %9285 = vmatpush3.bf16.msra.mxu0 %v9260_v15 }
  0x64   :  { %8631 = vmatmul.mubr.msk.f32.vlgmr.msra.gmra.mrb[22].mxu1 %vm181_vm1, %v9786_v53  ;;  %8643 = vmatprep.subr.mxu0 %v9559_v11 }
  0x65   :  { %8635 = vmatprep.mubr.msk.f32.mxu1 %vm9558_vm0, %v9559_v11 }
  0x66   :  { %8620 = vmatmul.mubr.msk.f32.vlgmr.msra.gmra.mrb[22].mxu0 %vm181_vm1, %v9786_v53 }
  0x67   :  { %8645 = vmatprep.mubr.msk.f32.mxu0 %vm9558_vm0, %v9559_v11 }
  0xde   :  { %v251_v16 = vpop.f32.mrb[0].mxu0 }
  0xdf   :  { %v8379_v17 = vpop.f32.mrb[1].mxu0  ;;  %v321_v18 = vpop.f32.mrb[0].mxu1  ;;  %v252_v58 = vadd.f32 %v251_v16, %v164_v48 }
  0xe0   :  { %v8390_v19 = vpop.f32.mrb[1].mxu1  ;;  %v322_v0 = vadd.f32 %v321_v18, %v168_v59 }
  0xe6   :  { %v9906_v20 = vpop.f32.mrb[2].mxu0 }
  0xe7   :  { %v8401_v21 = vpop.f32.mrb[3].mxu0  ;;  %v9908_v22 = vpop.f32.mrb[2].mxu1  ;;  %v392_v10 = vadd.f32 %v9906_v20, %v172_v1 }
  0xe8   :  { %v8412_v23 = vpop.f32.mrb[3].mxu1  ;;  %v462_v12 = vadd.f32 %v9908_v22, %v176_v4 }
  0xee   :  { %v9910_v27 = vpop.f32.mrb[4].mxu0 }
  0xef   :  { %v8423_v28 = vpop.f32.mrb[5].mxu0  ;;  %v9912_v29 = vpop.f32.mrb[4].mxu1  ;;  %v535_v19 = vadd.f32 %v9910_v27, %v164_v48 }
  0xf0   :  { %v8434_v30 = vpop.f32.mrb[5].mxu1  ;;  %v605_v20 = vadd.f32 %v9912_v29, %v168_v59  ;;  %v7845_v29 = vld.sshfl [vmem:[%s10695_s3 + $0x8] sm:$0x33 pattern:$0x75316420] }
  0xf1   :  { %v144_v30 = vcombine.high %v7845_v29, %v7845_v29  ;;  %v151_v37 = vrot.slane %v7845_v29, %v9917_v34 }
  0xf3   :  { %v158_v31 = vrot.slane %v144_v30, %v9917_v34 }
  0xf5   :  { %v1341_v32 = vrot.slane %v158_v31, %v9927_v42 }
  0xf6   :  { %v9919_v36 = vpop.f32.mrb[6].mxu0 }
  0xf7   :  { %v8445_v38 = vpop.f32.mrb[7].mxu0  ;;  %v9924_v39 = vpop.f32.mrb[6].mxu1  ;;  %v675_v27 = vadd.f32 %v9919_v36, %v172_v1 }
  0xf8   :  { %v8456_v41 = vpop.f32.mrb[7].mxu1  ;;  %v745_v28 = vadd.f32 %v9924_v39, %v176_v4  ;;  %v160_v38 = vcombine.high %v158_v31, %v158_v31  ;;  %v1337_v39 = vrot.slane %v151_v37, %v9927_v42 }
  0xfa   :  { %v1349_v40 = vrot.slane %v160_v38, %v9927_v42 }
  0xfe   :  { %v837_v50 = vpop.f32.mrb[8].mxu0 }
  0xff   :  { %v838_v51 = vadd.f32 %v837_v50, %v751_v46  ;;  %v8467_v52 = vpop.f32.mrb[9].mxu0  ;;  %v907_v53 = vpop.f32.mrb[8].mxu1 }
 0x100   :  { %v8478_v55 = vpop.f32.mrb[9].mxu1  ;;  %v908_v57 = vadd.f32 %v907_v53, %v755_v47 }
 0x101   :  { %8634 = vmatpush3.xpose.msk.msra.mxu1 %vm1914_vm2, %v838_v51 }
 0x102   :  { %8638 = vmatprep.subr.mxu1 %v9559_v11 }
 0x104   :  { %8636 = vmatmul.mubr.msk.f32.vlgmr.msra.gmra.mrb[24].mxu1 %vm1914_vm2, %v252_v58 }
 0x105   :  { %8639 = vmatpush3.xpose.msk.msra.mxu1 %vm1914_vm2, %v908_v57  ;;  %8640 = vmatprep.mubr.msk.f32.mxu1 %vm9558_vm0, %v9559_v11 }
 0x106   :  { %v977_v2 = vpop.f32.mrb[10].mxu0  ;;  %8648 = vmatprep.subr.mxu1 %v9559_v11 }
 0x107   :  { %v978_v5 = vadd.f32 %v977_v2, %v759_v62  ;;  %v1047_v6 = vpop.f32.mrb[10].mxu1  ;;  %v8489_v7 = vpop.f32.mrb[11].mxu0 }
 0x108   :  { %v1048_v8 = vadd.f32 %v1047_v6, %v763_v63  ;;  %8641 = vmatmul.mubr.msk.f32.vlgmr.msra.gmra.mrb[26].mxu1 %vm1914_vm2, %v322_v0  ;;  %v8500_v9 = vpop.f32.mrb[11].mxu1 }
 0x109   :  { %8644 = vmatpush3.xpose.msk.msra.mxu0 %vm1914_vm2, %v978_v5  ;;  %8650 = vmatprep.mubr.msk.f32.mxu1 %vm9558_vm0, %v9559_v11 }
 0x10a   :  { %8649 = vmatpush3.xpose.msk.msra.mxu1 %vm1914_vm2, %v1048_v8  ;;  %8653 = vmatprep.subr.mxu0 %v9559_v11 }
 0x10b   :  { %8658 = vmatprep.subr.mxu1 %v9559_v11 }
 0x10c   :  { %8646 = vmatmul.mubr.msk.f32.vlgmr.msra.gmra.mrb[24].mxu0 %vm1914_vm2, %v392_v10 }
 0x10d   :  { %8651 = vmatmul.mubr.msk.f32.vlgmr.msra.gmra.mrb[28].mxu1 %vm1914_vm2, %v462_v12  ;;  %8655 = vmatprep.mubr.msk.f32.mxu0 %vm9558_vm0, %v9559_v11 }
 0x10e   :  { %v1120_v13 = vpop.f32.mrb[12].mxu0  ;;  %8660 = vmatprep.mubr.msk.f32.mxu1 %vm9558_vm0, %v9559_v11 }
 0x10f   :  { %v1121_v14 = vadd.f32 %v1120_v13, %v751_v46  ;;  %v1190_v15 = vpop.f32.mrb[12].mxu1  ;;  %v8511_v16 = vpop.f32.mrb[13].mxu0  ;;  %v159_v46 = vcombine.high %v151_v37, %v151_v37 }
 0x110   :  { %v1191_v17 = vadd.f32 %v1190_v15, %v755_v47  ;;  %v8522_v18 = vpop.f32.mrb[13].mxu1 }
 0x111   :  { %8654 = vmatpush3.xpose.msk.msra.mxu0 %vm1914_vm2, %v1121_v14  ;;  %v1345_v49 = vrot.slane %v159_v46, %v9927_v42 }
 0x112   :  { %8659 = vmatpush3.xpose.msk.msra.mxu1 %vm1914_vm2, %v1191_v17  ;;  %8663 = vmatprep.subr.mxu0 %v9559_v11 }
 0x113   :  { %8668 = vmatprep.subr.mxu1 %v9559_v11 }
 0x114   :  { %8656 = vmatmul.mubr.msk.f32.vlgmr.msra.gmra.mrb[26].mxu0 %vm1914_vm2, %v535_v19 }
 0x115   :  { %8661 = vmatmul.mubr.msk.f32.vlgmr.msra.gmra.mrb[30].mxu1 %vm1914_vm2, %v605_v20  ;;  %8665 = vmatprep.mubr.msk.f32.mxu0 %vm9558_vm0, %v9559_v11 }
 0x116   :  { %v1260_v21 = vpop.f32.mrb[14].mxu0  ;;  %8670 = vmatprep.mubr.msk.f32.mxu1 %vm9558_vm0, %v9559_v11 }
 0x117   :  { %v1261_v22 = vadd.f32 %v1260_v21, %v759_v62  ;;  %v1330_v23 = vpop.f32.mrb[14].mxu1  ;;  %v8533_v24 = vpop.f32.mrb[15].mxu0 }
 0x118   :  { %v1331_v25 = vadd.f32 %v1330_v23, %v763_v63  ;;  %v8544_v26 = vpop.f32.mrb[15].mxu1 }
 0x119   :  { %8664 = vmatpush3.xpose.msk.msra.mxu0 %vm1914_vm2, %v1261_v22 }
 0x11a   :  { %8669 = vmatpush3.xpose.msk.msra.mxu1 %vm1914_vm2, %v1331_v25  ;;  %8673 = vmatprep.subr.mxu0 %v9559_v11 }
 0x11b   :  { %8678 = vmatprep.subr.mxu1 %v9559_v11 }
 0x11c   :  { %8666 = vmatmul.mubr.msk.f32.vlgmr.msra.gmra.mrb[28].mxu0 %vm1914_vm2, %v675_v27 }
 0x11d   :  { %8671 = vmatmul.mubr.msk.f32.vlgmr.msra.gmra.mrb[32].mxu1 %vm1914_vm2, %v745_v28  ;;  %8675 = vmatprep.mubr.msk.f32.mxu0 %vm9558_vm0, %v9559_v11 }
 0x11e   :  { %8680 = vmatprep.mubr.msk.f32.mxu1 %vm9558_vm0, %v9559_v11 }
 0x11f   :  { %v1490_v33 = vpop.f32.mrb[16].mxu1 }
 0x120   :  { %v1491_v35 = vadd.f32 %v1490_v33, %v1341_v32  ;;  %v8566_v36 = vpop.f32.mrb[17].mxu1 }
 0x121   :  { %v1420_v41 = vpop.f32.mrb[16].mxu0 }
 0x122   :  { %8679 = vmatpush3.msra.mxu1 %v1491_v35  ;;  %v1421_v43 = vadd.f32 %v1420_v41, %v1337_v39  ;;  %v8555_v44 = vpop.f32.mrb[17].mxu0 }
 0x123   :  { %8688 = vmatprep.subr.mxu1 %v9559_v11 }
 0x124   :  { %8674 = vmatpush3.msra.mxu0 %v1421_v43 }
 0x125   :  { %8683 = vmatprep.subr.mxu0 %v9559_v11 }
 0x127   :  { %v1630_v45 = vpop.f32.mrb[18].mxu1 }
 0x128   :  { %v9995_v47 = vadd.f32 %v1630_v45, %v1349_v40  ;;  %v8588_v48 = vpop.f32.mrb[19].mxu1 }
 0x129   :  { %v1560_v50 = vpop.f32.mrb[18].mxu0 }
 0x12a   :  { %v9999_v51 = vadd.f32 %v1560_v50, %v1345_v49  ;;  %v8577_v52 = vpop.f32.mrb[19].mxu0 }
 0x12f   :  { %v1770_v53 = vpop.f32.mrb[20].mxu1 }
 0x130   :  { %v10001_v54 = vadd.f32 %v1770_v53, %v1341_v32  ;;  %v8610_v55 = vpop.f32.mrb[21].mxu1 }
 0x131   :  { %v1700_v56 = vpop.f32.mrb[20].mxu0 }
 0x132   :  { %v10003_v57 = vadd.f32 %v1700_v56, %v1337_v39  ;;  %v8599_v58 = vpop.f32.mrb[21].mxu0 }
 0x137   :  { %v1910_v59 = vpop.f32.mrb[22].mxu1 }
 0x138   :  { %v10005_v60 = vadd.f32 %v1910_v59, %v1349_v40  ;;  %v8632_v61 = vpop.f32.mrb[23].mxu1 }
 0x139   :  { %v1840_v62 = vpop.f32.mrb[22].mxu0 }
 0x13a   :  { %v10007_v63 = vadd.f32 %v1840_v62, %v1345_v49  ;;  %v8621_v0 = vpop.f32.mrb[23].mxu0 }
 0x1d7   :  { %v1987_v1 = vpop.f32.mrb[24].mxu1 }
 0x1d8   :  { %v8637_v2 = vpop.f32.mrb[25].mxu1  ;;  %v2523_v4 = vsel %vm1914_vm2, %v1987_v1, -inf }
 0x1d9   :  { %2524 = vmax.xlane.f32.xlu0 %v2523_v4 }
 0x1db   :  { %v2063_v5 = vpop.f32.mrb[26].mxu1 }
 0x1dc   :  { %v8642_v6 = vpop.f32.mrb[27].mxu1  ;;  %v2526_v7 = vsel %vm1914_vm2, %v2063_v5, -inf }
 0x1dd   :  { %2527 = vmax.xlane.f32.xlu0 %v2526_v7 }
 0x1df   :  { %v2139_v8 = vpop.f32.mrb[24].mxu0 }
 0x1e0   :  { %v2215_v9 = vpop.f32.mrb[28].mxu1  ;;  %v8647_v10 = vpop.f32.mrb[25].mxu0  ;;  %v2529_v12 = vsel %vm1914_vm2, %v2139_v8, -inf }
 0x1e1   :  { %v8652_v13 = vpop.f32.mrb[29].mxu1  ;;  %2530 = vmax.xlane.f32.xlu1 %v2529_v12  ;;  %v2532_v14 = vsel %vm1914_vm2, %v2215_v9, -inf }
 0x1e5   :  { %2533 = vmax.xlane.f32.xlu1 %v2532_v14 }
 0x1e7   :  { %v2291_v15 = vpop.f32.mrb[26].mxu0 }
 0x1e8   :  { %v2367_v16 = vpop.f32.mrb[30].mxu1  ;;  %v8657_v17 = vpop.f32.mrb[27].mxu0  ;;  %v2535_v18 = vsel %vm1914_vm2, %v2291_v15, -inf }
 0x1e9   :  { %v8662_v19 = vpop.f32.mrb[31].mxu1  ;;  %v2538_v20 = vsel %vm1914_vm2, %v2367_v16, -inf  ;;  %2536 = vmax.xlane.f32.xlu0 %v2535_v18 }
 0x1ea   :  { %2539 = vmax.xlane.f32.xlu1 %v2538_v20 }
 0x1ef   :  { %v2443_v21 = vpop.f32.mrb[28].mxu0 }
 0x1f0   :  { %v2519_v22 = vpop.f32.mrb[32].mxu1  ;;  %v8667_v23 = vpop.f32.mrb[29].mxu0  ;;  %v2541_v24 = vsel %vm1914_vm2, %v2443_v21, -inf }
 0x1f1   :  { %v8672_v25 = vpop.f32.mrb[33].mxu1  ;;  %v2544_v26 = vsel %vm1914_vm2, %v2519_v22, -inf  ;;  %2542 = vmax.xlane.f32.xlu0 %v2541_v24 }
 0x1f2   :  { %2545 = vmax.xlane.f32.xlu1 %v2544_v26 }
 0x266   :  { %v2525_v27 = vpop.xlane.xlu0 %2524 }
 0x267   :  { %v2547_v28 = vsub.f32 %v1987_v1, %v2525_v27 }
 0x269   :  { %v2555_v29 = vmul.f32 1.442695, %v2547_v28 }
 0x26a   :  { %v2528_v30 = vpop.xlane.xlu0 %2527 }
 0x26b   :  { %9451 = vpow2.f32 %v2555_v29  ;;  %v2548_v31 = vsub.f32 %v2063_v5, %v2528_v30 }
 0x26d   :  { %v2557_v32 = vmul.f32 1.442695, %v2548_v31 }
 0x26e   :  { %v2531_v33 = vpop.xlane.xlu1 %2530 }
 0x26f   :  { %9453 = vpow2.f32 %v2557_v32  ;;  %v2549_v35 = vsub.f32 %v2139_v8, %v2531_v33  ;;  %v3197_v33 = vld [vmem:[%s10696_s4 + $0x10] sm:$0xff] }
 0x271   :  { %v2559_v36 = vmul.f32 1.442695, %v2549_v35 }
 0x272   :  { %v2534_v37 = vpop.xlane.xlu1 %2533 }
 0x273   :  { %9455 = vpow2.f32 %v2559_v36  ;;  %v2550_v38 = vsub.f32 %v2215_v9, %v2534_v37  ;;  %v3198_v37 = vld [vmem:[%s10696_s4 + $0x18] sm:$0xff] }
 0x275   :  { %v9452_v39 = vpop.eup %9451  ;;  %v2561_v40 = vmul.f32 1.442695, %v2550_v38 }
 0x276   :  { %v2537_v41 = vpop.xlane.xlu0 %2536  ;;  %v2571_v43 = vsel %vm1914_vm2, %v9452_v39, 0.0 }
 0x277   :  { %9457 = vpow2.f32 %v2561_v40  ;;  %v2540_v44 = vpop.xlane.xlu1 %2539  ;;  %v2551_v45 = vsub.f32 %v2291_v15, %v2537_v41  ;;  %2572 = vadd.xlane.f32.xlu0 %v2571_v43 }
 0x278   :  { %v2552_v46 = vsub.f32 %v2367_v16, %v2540_v44 }
 0x279   :  { %v9454_v48 = vpop.eup %9453  ;;  %v2563_v49 = vmul.f32 1.442695, %v2551_v45 }
 0x27a   :  { %v2565_v50 = vmul.f32 1.442695, %v2552_v46  ;;  %v2574_v52 = vsel %vm1914_vm2, %v9454_v48, 0.0 }
 0x27b   :  { %9459 = vpow2.f32 %v2563_v49  ;;  %2575 = vadd.xlane.f32.xlu1 %v2574_v52 }
 0x27c   :  { %9461 = vpow2.f32 %v2565_v50 }
 0x27d   :  { %v9456_v53 = vpop.eup %9455 }
 0x27e   :  { %v2543_v55 = vpop.xlane.xlu0 %2542  ;;  %v2577_v56 = vsel %vm1914_vm2, %v9456_v53, 0.0 }
 0x27f   :  { %v2546_v58 = vpop.xlane.xlu1 %2545  ;;  %v2553_v59 = vsub.f32 %v2443_v21, %v2543_v55  ;;  %2578 = vadd.xlane.f32.xlu0 %v2577_v56 }
 0x280   :  { %v2554_v61 = vsub.f32 %v2519_v22, %v2546_v58 }
 0x281   :  { %v9458_v62 = vpop.eup %9457  ;;  %v2567_v0 = vmul.f32 1.442695, %v2553_v59 }
 0x282   :  { %v2569_v1 = vmul.f32 1.442695, %v2554_v61  ;;  %v2580_v2 = vsel %vm1914_vm2, %v9458_v62, 0.0 }
 0x283   :  { %9463 = vpow2.f32 %v2567_v0  ;;  %2581 = vadd.xlane.f32.xlu1 %v2580_v2 }
 0x284   :  { %9465 = vpow2.f32 %v2569_v1 }
 0x285   :  { %v9460_v4 = vpop.eup %9459 }
 0x286   :  { %v9462_v5 = vpop.eup %9461  ;;  %v2583_v6 = vsel %vm1914_vm2, %v9460_v4, 0.0 }
 0x287   :  { %v2586_v7 = vsel %vm1914_vm2, %v9462_v5, 0.0  ;;  %2584 = vadd.xlane.f32.xlu0 %v2583_v6 }
 0x288   :  { %2587 = vadd.xlane.f32.xlu1 %v2586_v7 }
 0x28d   :  { %v9464_v8 = vpop.eup %9463 }
 0x28e   :  { %v9466_v9 = vpop.eup %9465  ;;  %v2589_v10 = vsel %vm1914_vm2, %v9464_v8, 0.0 }
 0x28f   :  { %v2592_v12 = vsel %vm1914_vm2, %v9466_v9, 0.0  ;;  %2590 = vadd.xlane.f32.xlu0 %v2589_v10 }
 0x290   :  { %2593 = vadd.xlane.f32.xlu1 %v2592_v12 }
 0x304   :  { %v2573_v13 = vpop.xlane.xlu0 %2572 }
 0x305   :  { %9467 = vrcp.f32 %v2573_v13 }
 0x308   :  { %v2576_v14 = vpop.xlane.xlu1 %2575 }
 0x309   :  { %9469 = vrcp.f32 %v2576_v14 }
 0x30c   :  { %v2579_v15 = vpop.xlane.xlu0 %2578 }
 0x30d   :  { %9471 = vrcp.f32 %v2579_v15 }
 0x30f   :  { %v9468_v16 = vpop.eup %9467 }
 0x310   :  { %v2596_v17 = vmul.f32 %v9468_v16, %v9452_v39  ;;  %v2582_v18 = vpop.xlane.xlu1 %2581 }
 0x311   :  { %9473 = vrcp.f32 %v2582_v18 }
 0x312   :  { %8676 = vmatmul.mubr.msk.f32.vlgmr.msra.gmra.mrb[30].mxu0 %vm1914_vm2, %v2596_v17 }
 0x313   :  { %v9470_v19 = vpop.eup %9469  ;;  %8684 = vmatpush3.msra.mxu0 %v9999_v51  ;;  %8685 = vmatprep.mubr.msk.f32.mxu0 %vm9558_vm0, %v9559_v11 }
 0x314   :  { %v2598_v20 = vmul.f32 %v9470_v19, %v9454_v48  ;;  %v2585_v21 = vpop.xlane.xlu0 %2584  ;;  %8693 = vmatprep.subr.mxu0 %v9559_v11 }
 0x315   :  { %v2588_v22 = vpop.xlane.xlu1 %2587  ;;  %9475 = vrcp.f32 %v2585_v21 }
 0x316   :  { %9477 = vrcp.f32 %v2588_v22  ;;  %8681 = vmatmul.mubr.msk.f32.vlgmr.msra.gmra.mrb[34].mxu1 %vm1914_vm2, %v2598_v20  ;;  %v9527_v20 = vld [vmem:[%s10692_s0] sm:$0xff] }
 0x317   :  { %v9472_v23 = vpop.eup %9471  ;;  %8689 = vmatpush3.msra.mxu1 %v9995_v47  ;;  %8690 = vmatprep.mubr.msk.f32.mxu1 %vm9558_vm0, %v9559_v11 }
 0x318   :  { %v2600_v24 = vmul.f32 %v9472_v23, %v9456_v53  ;;  %8698 = vmatprep.subr.mxu1 %v9559_v11 }
 0x31a   :  { %8686 = vmatmul.mubr.msk.f32.vlgmr.msra.gmra.mrb[32].mxu0 %vm1914_vm2, %v2600_v24 }
 0x31b   :  { %v9474_v51 = vpop.eup %9473  ;;  %8694 = vmatpush3.msra.mxu0 %v10003_v57  ;;  %8695 = vmatprep.mubr.msk.f32.mxu0 %vm9558_vm0, %v9559_v11 }
 0x31c   :  { %v2602_v25 = vmul.f32 %v9474_v51, %v9458_v62  ;;  %v2591_v26 = vpop.xlane.xlu0 %2590  ;;  %8703 = vmatprep.subr.mxu0 %v9559_v11 }
 0x31d   :  { %v2594_v27 = vpop.xlane.xlu1 %2593  ;;  %9479 = vrcp.f32 %v2591_v26 }
 0x31e   :  { %9481 = vrcp.f32 %v2594_v27  ;;  %8691 = vmatmul.mubr.msk.f32.vlgmr.msra.gmra.mrb[36].mxu1 %vm1914_vm2, %v2602_v25 }
 0x31f   :  { %v9476_v47 = vpop.eup %9475  ;;  %8699 = vmatpush3.msra.mxu1 %v10001_v54  ;;  %8700 = vmatprep.mubr.msk.f32.mxu1 %vm9558_vm0, %v9559_v11 }
 0x320   :  { %v9478_v28 = vpop.eup %9477  ;;  %v2604_v57 = vmul.f32 %v9476_v47, %v9460_v4  ;;  %8708 = vmatprep.subr.mxu1 %v9559_v11 }
 0x321   :  { %v2606_v29 = vmul.f32 %v9478_v28, %v9462_v5 }
 0x322   :  { %8696 = vmatmul.mubr.msk.f32.vlgmr.msra.gmra.mrb[34].mxu0 %vm1914_vm2, %v2604_v57 }
 0x323   :  { %8701 = vmatmul.mubr.msk.f32.vlgmr.msra.gmra.mrb[38].mxu1 %vm1914_vm2, %v2606_v29  ;;  %8704 = vmatpush3.msra.mxu0 %v10007_v63  ;;  %v3196_v63 = vld [vmem:[%s10696_s4 + $0x8] sm:$0xff] }
 0x324   :  { %8709 = vmatpush3.msra.mxu1 %v10005_v60  ;;  %8705 = vmatprep.mubr.msk.f32.mxu0 %vm9558_vm0, %v9559_v11  ;;  %v3195_v60 = vld [vmem:[%s10696_s4] sm:$0xff] }
 0x325   :  { %8710 = vmatprep.mubr.msk.f32.mxu1 %vm9558_vm0, %v9559_v11  ;;  %8713 = vmatprep.subr.mxu0 %v9559_v11 }
 0x326   :  { %8718 = vmatprep.subr.mxu1 %v9559_v11 }
 0x327   :  { %v9480_v54 = vpop.eup %9479 }
 0x328   :  { %v9482_v30 = vpop.eup %9481  ;;  %v2608_v31 = vmul.f32 %v9480_v54, %v9464_v8  ;;  %v9528_v54 = vld [vmem:[%s10692_s0 + $0x8] sm:$0xff] }
 0x329   :  { %v2610_v32 = vmul.f32 %v9482_v30, %v9466_v9  ;;  %v7902_v9 = vld [vmem:[%s10698_s6] ss:$0 sm:$0xff] }
 0x32a   :  { %8706 = vmatmul.mubr.msk.f32.vlgmr.msra.gmra.mrb[36].mxu0 %vm1914_vm2, %v2608_v31 }
 0x32b   :  { %8711 = vmatmul.mubr.msk.f32.vlgmr.msra.gmra.mrb[40].mxu1 %vm1914_vm2, %v2610_v32  ;;  %8715 = vmatprep.mubr.msk.f32.mxu0 %vm9558_vm0, %v9559_v11 }
 0x32c   :  { %8720 = vmatprep.mubr.msk.f32.mxu1 %vm9558_vm0, %v9559_v11  ;;  %8714 = vmatpush3.msra.mxu0 %v3195_v60 }
 0x32d   :  { %8723 = vmatprep.subr.mxu0 %v9559_v11  ;;  %8719 = vmatpush3.msra.mxu1 %v3196_v63 }
 0x32e   :  { %8728 = vmatprep.subr.mxu1 %v9559_v11 }
 0x3e5   :  { %v2680_v35 = vpop.f32.mrb[30].mxu0 }
 0x3e6   :  { %v8677_v36 = vpop.f32.mrb[31].mxu0  ;;  %8716 = vmatmul.mubr.msk.f32.vlgmr.msra.gmra.mrb[38].mxu0 %vm1914_vm2, %v2680_v35 }
 0x3e7   :  { %8724 = vmatpush3.msra.mxu0 %v3197_v33  ;;  %8725 = vmatprep.mubr.msk.f32.mxu0 %vm9558_vm0, %v9559_v11 }
 0x3e8   :  { %8733 = vmatprep.subr.mxu0 %v9559_v11 }
 0x3e9   :  { %v2753_v38 = vpop.f32.mrb[34].mxu1 }
 0x3ea   :  { %v8682_v39 = vpop.f32.mrb[35].mxu1  ;;  %8721 = vmatmul.mubr.msk.f32.vlgmr.msra.gmra.mrb[42].mxu1 %vm1914_vm2, %v2753_v38 }
 0x3eb   :  { %8729 = vmatpush3.msra.mxu1 %v3198_v37  ;;  %8730 = vmatprep.mubr.msk.f32.mxu1 %vm9558_vm0, %v9559_v11 }
 0x3ec   :  { %8738 = vmatprep.subr.mxu1 %v9559_v11 }
 0x3ed   :  { %v2826_v40 = vpop.f32.mrb[32].mxu0 }
 0x3ee   :  { %v8687_v41 = vpop.f32.mrb[33].mxu0  ;;  %8726 = vmatmul.mubr.msk.f32.vlgmr.msra.gmra.mrb[40].mxu0 %vm1914_vm2, %v2826_v40 }
 0x3ef   :  { %8734 = vmatpush3.msra.mxu0 %v3195_v60  ;;  %8735 = vmatprep.mubr.msk.f32.mxu0 %vm9558_vm0, %v9559_v11  ;;  %v7905_v41 = vld [vmem:[%s10694_s2 + $0x180] sm:$0xff] }
 0x3f0   :  { %8743 = vmatprep.subr.mxu0 %v9559_v11 }
 0x3f1   :  { %v2899_v43 = vpop.f32.mrb[36].mxu1 }
 0x3f2   :  { %v8692_v44 = vpop.f32.mrb[37].mxu1  ;;  %8731 = vmatmul.mubr.msk.f32.vlgmr.msra.gmra.mrb[44].mxu1 %vm1914_vm2, %v2899_v43  ;;  %v7906_v43 = vld [vmem:[%s10694_s2 + $0x188] sm:$0xff] }
 0x3f3   :  { %8739 = vmatpush3.msra.mxu1 %v3196_v63  ;;  %8740 = vmatprep.mubr.msk.f32.mxu1 %vm9558_vm0, %v9559_v11  ;;  %v7909_v44 = vld [vmem:[%s10694_s2 + $0x1a0] sm:$0xff] }
 0x3f4   :  { %8748 = vmatprep.subr.mxu1 %v9559_v11 }
 0x3f5   :  { %v2972_v45 = vpop.f32.mrb[34].mxu0 }
 0x3f6   :  { %v3045_v46 = vpop.f32.mrb[38].mxu1  ;;  %v8697_v48 = vpop.f32.mrb[35].mxu0  ;;  %8736 = vmatmul.mubr.msk.f32.vlgmr.msra.gmra.mrb[42].mxu0 %vm1914_vm2, %v2972_v45  ;;  %v9293_v45 = vpack.c.bf16 %v7906_v43, %v7905_v41  ;;  %v7935_v41 = vld [vmem:[%s10694_s2 + $0x270] sm:$0xff]  ;;  %v7936_v43 = vld [vmem:[%s10694_s2 + $0x278] sm:$0xff] }
 0x3f7   :  { %v8702_v49 = vpop.f32.mrb[39].mxu1  ;;  %8741 = vmatmul.mubr.msk.f32.vlgmr.msra.gmra.mrb[46].mxu1 %vm1914_vm2, %v3045_v46  ;;  %8744 = vmatpush3.msra.mxu0 %v3197_v33  ;;  %v7910_v46 = vld [vmem:[%s10694_s2 + $0x1a8] sm:$0xff] }
 0x3f8   :  { %8745 = vmatprep.mubr.msk.f32.mxu0 %vm9558_vm0, %v9559_v11  ;;  %8749 = vmatpush3.msra.mxu1 %v3198_v37  ;;  %v9299_v48 = vpack.c.bf16 %v7910_v46, %v7909_v44  ;;  %v7907_v49 = vld [vmem:[%s10694_s2 + $0x190] sm:$0xff]  ;;  %v10292_v44 = vld [vmem:[%s10693_s1] sm:$0xff]  ;;  %v9362_v46 = vpack.c.bf16 %v7936_v43, %v7935_v41 }
 0x3f9   :  { %8750 = vmatprep.mubr.msk.f32.mxu1 %vm9558_vm0, %v9559_v11  ;;  %9292 = vmatprep.subr.bf16.mxu0 %v9557_v3 }
 0x3fa   :  { %9298 = vmatprep.subr.bf16.mxu1 %v9557_v3 }
 0x3fd   :  { %v3118_v50 = vpop.f32.mrb[36].mxu0 }
 0x3fe   :  { %v3191_v52 = vpop.f32.mrb[40].mxu1  ;;  %v8707_v53 = vpop.f32.mrb[37].mxu0  ;;  %8746 = vmatmul.mubr.msk.f32.vlgmr.msra.gmra.mrb[44].mxu0 %vm1914_vm2, %v3118_v50  ;;  %v7908_v50 = vld [vmem:[%s10694_s2 + $0x198] sm:$0xff] }
 0x3ff   :  { %v8712_v55 = vpop.f32.mrb[41].mxu1  ;;  %8751 = vmatmul.mubr.msk.f32.vlgmr.msra.gmra.mrb[48].mxu1 %vm1914_vm2, %v3191_v52  ;;  %8761 = vmatprep.mubr.msk.f32.mxu0 %vm9558_vm0, %v9559_v11  ;;  %v7911_v52 = vld [vmem:[%s10694_s2 + $0x1b0] sm:$0xff]  ;;  %v9296_v53 = vpack.c.bf16 %v7908_v50, %v7907_v49  ;;  %v7937_v49 = vld [vmem:[%s10694_s2 + $0x280] sm:$0xff]  ;;  %v7938_v50 = vld [vmem:[%s10694_s2 + $0x288] sm:$0xff] }
 0x400   :  { %8772 = vmatprep.mubr.msk.f32.mxu1 %vm9558_vm0, %v9559_v11  ;;  %9294 = vmatpush3.bf16.msra.mxu0 %v9293_v45  ;;  %v7912_v55 = vld [vmem:[%s10694_s2 + $0x1b8] sm:$0xff] }
 0x401   :  { %9300 = vmatpush3.bf16.msra.mxu1 %v9299_v48  ;;  %9295 = vmatprep.subr.bf16.mxu0 %v9557_v3 }
 0x402   :  { %9301 = vmatprep.subr.bf16.mxu1 %v9557_v3 }
 0x404   :  { %9297 = vmatpush3.bf16.msra.mxu0 %v9296_v53 }
 0x405   :  { %9304 = vmatprep.subr.bf16.mxu0 %v9557_v3 }
 0x4b9   :  { %v3268_v56 = vpop.f32.mrb[38].mxu0 }
 0x4ba   :  { %v8717_v58 = vpop.f32.mrb[39].mxu0  ;;  %v3783_v61 = vsel %vm181_vm1, %v3268_v56, 0.0  ;;  %v9302_v56 = vpack.c.bf16 %v7912_v55, %v7911_v52  ;;  %v7941_v52 = vld [vmem:[%s10694_s2 + $0x2a0] sm:$0xff]  ;;  %v9389_v55 = vpack.c.bf16 %v7938_v50, %v7937_v49 }
 0x4bc   :  { %9303 = vmatpush3.bf16.msra.mxu1 %v9302_v56 }
 0x4bd   :  { %v3341_v59 = vpop.f32.mrb[42].mxu1  ;;  %9310 = vmatprep.subr.bf16.mxu1 %v9557_v3 }
 0x4be   :  { %v3784_v62 = vsel %vm181_vm1, %v3341_v59, 0.0  ;;  %v8722_v0 = vpop.f32.mrb[43].mxu1 }
 0x4bf   :  { %v3785_v1 = vadd.f32 %v3784_v62, %v3783_v61 }
 0x4c1   :  { %v3414_v2 = vpop.f32.mrb[40].mxu0 }
 0x4c2   :  { %v3786_v4 = vsel %vm181_vm1, %v3414_v2, 0.0  ;;  %v8727_v5 = vpop.f32.mrb[41].mxu0  ;;  %v7903_v2 = vld [vmem:[%s10698_s6 + $0x1] ss:$0 sm:$0xff] }
 0x4c3   :  { %v3787_v6 = vadd.f32 %v3786_v4, %v3785_v1  ;;  %v7913_v4 = vld [vmem:[%s10694_s2 + $0x1c0] sm:$0xff] }
 0x4c5   :  { %v3487_v7 = vpop.f32.mrb[44].mxu1 }
 0x4c6   :  { %v3788_v8 = vsel %vm181_vm1, %v3487_v7, 0.0  ;;  %v8732_v10 = vpop.f32.mrb[45].mxu1  ;;  %v7917_v7 = vld [vmem:[%s10694_s2 + $0x1e0] sm:$0xff] }
 0x4c7   :  { %v3789_v12 = vadd.f32 %v3788_v8, %v3787_v6  ;;  %v7914_v6 = vld [vmem:[%s10694_s2 + $0x1c8] sm:$0xff]  ;;  %v7904_v10 = vld [vmem:[%s10698_s6 + $0x2] ss:$0 sm:$0xff] }
 0x4c8   :  { %v7918_v8 = vld [vmem:[%s10694_s2 + $0x1e8] sm:$0xff] }
 0x4c9   :  { %v3802_v13 = vadd.f32 %v7902_v9, %v3789_v12  ;;  %v3560_v14 = vpop.f32.mrb[42].mxu0 }
 0x4ca   :  { %v3790_v15 = vsel %vm181_vm1, %v3560_v14, 0.0  ;;  %v3633_v16 = vpop.f32.mrb[46].mxu1  ;;  %v8737_v17 = vpop.f32.mrb[43].mxu0  ;;  %v9311_v14 = vpack.c.bf16 %v7918_v8, %v7917_v7 }
 0x4cb   :  { %v3791_v18 = vsel %vm181_vm1, %v3633_v16, 0.0  ;;  %v8742_v19 = vpop.f32.mrb[47].mxu1  ;;  %v3804_v21 = vadd.f32 %v9527_v20, %v3802_v13  ;;  %v9305_v13 = vpack.c.bf16 %v7914_v6, %v7913_v4  ;;  %v7916_v17 = vld [vmem:[%s10694_s2 + $0x1d8] sm:$0xff]  ;;  %v7950_v6 = vld [vmem:[%s10694_s2 + $0x2e8] sm:$0xff] }
 0x4cc   :  { %v3792_v22 = vadd.f32 %v3791_v18, %v3790_v15  ;;  %v7915_v15 = vld [vmem:[%s10694_s2 + $0x1d0] sm:$0xff]  ;;  %v7920_v19 = vld [vmem:[%s10694_s2 + $0x1f8] sm:$0xff] }
 0x4cd   :  { %v3808_v23 = vsel %vm181_vm1, %v3804_v21, 0.0  ;;  %v7919_v18 = vld [vmem:[%s10694_s2 + $0x1f0] sm:$0xff]  ;;  %v9308_v20 = vpack.c.bf16 %v7916_v17, %v7915_v15 }
 0x4ce   :  { %3809 = vadd.xlane.f32.xlu0 %v3808_v23 }
 0x4d1   :  { %v3706_v24 = vpop.f32.mrb[44].mxu0 }
 0x4d2   :  { %v3793_v51 = vsel %vm181_vm1, %v3706_v24, 0.0  ;;  %v3779_v25 = vpop.f32.mrb[48].mxu1  ;;  %v8747_v26 = vpop.f32.mrb[45].mxu0 }
 0x4d3   :  { %v3794_v27 = vadd.f32 %v3793_v51, %v3792_v22  ;;  %v8752_v47 = vpop.f32.mrb[49].mxu1  ;;  %v3795_v28 = vsel %vm181_vm1, %v3779_v25, 0.0  ;;  %v7921_v25 = vld [vmem:[%s10694_s2 + $0x200] sm:$0xff]  ;;  %v7922_v26 = vld [vmem:[%s10694_s2 + $0x208] sm:$0xff] }
 0x4d4   :  { %v7926_v47 = vld [vmem:[%s10694_s2 + $0x228] sm:$0xff] }
 0x4d5   :  { %v3796_v57 = vadd.f32 %v3795_v28, %v3794_v27  ;;  %v7925_v27 = vld [vmem:[%s10694_s2 + $0x220] sm:$0xff]  ;;  %v9341_v28 = vpack.c.bf16 %v7922_v26, %v7921_v25 }
 0x4d7   :  { %v3803_v29 = vadd.f32 %v7902_v9, %v3796_v57  ;;  %v9347_v57 = vpack.c.bf16 %v7926_v47, %v7925_v27  ;;  %v7956_v47 = vld.sshfl [vmem:[%s10695_s3 + $0x10] sm:$0x33 pattern:$0x75316420] }
 0x4d9   :  { %v3805_v30 = vadd.f32 %v9528_v54, %v3803_v29  ;;  %v7923_v29 = vld [vmem:[%s10694_s2 + $0x210] sm:$0xff]  ;;  %v7924_v54 = vld [vmem:[%s10694_s2 + $0x218] sm:$0xff] }
 0x4db   :  { %v3811_v31 = vsel %vm181_vm1, %v3805_v30, 0.0 }
 0x4dc   :  { %3812 = vadd.xlane.f32.xlu1 %v3811_v31  ;;  %v7928_v31 = vld [vmem:[%s10694_s2 + $0x238] sm:$0xff] }
 0x55b   :  { %v3810_v32 = vpop.xlane.xlu0 %3809 }
 0x55c   :  { %v3815_v60 = vmul.f32 0.03125, %v3810_v32  ;;  %v9344_v32 = vpack.c.bf16 %v7924_v54, %v7923_v29 }
 0x55e   :  { %v3817_v63 = vsub.f32 %v3804_v21, %v3815_v60  ;;  %v9314_v21 = vpack.c.bf16 %v7920_v19, %v7919_v18 }
 0x560   :  { %v3819_v33 = vmul.f32 %v3817_v63, %v3817_v63 }
 0x562   :  { %v3821_v35 = vsel %vm181_vm1, %v3819_v33, 0.0  ;;  %v7930_v33 = vld [vmem:[%s10694_s2 + $0x248] sm:$0xff] }
 0x563   :  { %3822 = vadd.xlane.f32.xlu0 %v3821_v35  ;;  %v7933_v35 = vld [vmem:[%s10694_s2 + $0x260] sm:$0xff] }
 0x569   :  { %v3813_v36 = vpop.xlane.xlu1 %3812 }
 0x56a   :  { %v3816_v37 = vmul.f32 0.03125, %v3813_v36  ;;  %v7934_v36 = vld [vmem:[%s10694_s2 + $0x268] sm:$0xff] }
 0x56c   :  { %v10125_v38 = vsub.f32 %v3805_v30, %v3816_v37  ;;  %v7927_v30 = vld [vmem:[%s10694_s2 + $0x230] sm:$0xff] }
 0x56d   :  { %v9350_v60 = vpack.c.bf16 %v7928_v31, %v7927_v30 }
 0x56e   :  { %v3820_v39 = vmul.f32 %v10125_v38, %v10125_v38 }
 0x570   :  { %v3824_v40 = vsel %vm181_vm1, %v3820_v39, 0.0  ;;  %v7931_v39 = vld [vmem:[%s10694_s2 + $0x250] sm:$0xff] }
 0x571   :  { %3825 = vadd.xlane.f32.xlu1 %v3824_v40  ;;  %v7932_v40 = vld [vmem:[%s10694_s2 + $0x258] sm:$0xff] }
 0x5f0   :  { %v3823_v58 = vpop.xlane.xlu0 %3822 }
 0x5f1   :  { %v3827_v59 = vmul.f32 0.03125, %v3823_v58  ;;  %v7939_v58 = vld [vmem:[%s10694_s2 + $0x290] sm:$0xff] }
 0x5f3   :  { %v3829_v61 = vadd.f32 1e-05, %v3827_v59  ;;  %v7940_v59 = vld [vmem:[%s10694_s2 + $0x298] sm:$0xff] }
 0x5f5   :  { %9483 = vrsqrt.f32 %v3829_v61  ;;  %v7943_v61 = vld [vmem:[%s10694_s2 + $0x2b0] sm:$0xff] }
 0x5fe   :  { %v3826_v62 = vpop.xlane.xlu1 %3825 }
 0x5ff   :  { %v9484_v0 = vpop.eup %9483  ;;  %v3828_v1 = vmul.f32 0.03125, %v3826_v62  ;;  %v9392_v62 = vpack.c.bf16 %v7940_v59, %v7939_v58 }
 0x600   :  { %v3833_v5 = vmul.f32 %v9484_v0, %v3817_v63  ;;  %v7929_v63 = vld [vmem:[%s10694_s2 + $0x240] sm:$0xff]  ;;  %v7944_v0 = vld [vmem:[%s10694_s2 + $0x2b8] sm:$0xff] }
 0x601   :  { %v3830_v9 = vadd.f32 1e-05, %v3828_v1  ;;  %v9353_v37 = vpack.c.bf16 %v7930_v33, %v7929_v63  ;;  %v7945_v1 = vld [vmem:[%s10694_s2 + $0x2c0] sm:$0xff]  ;;  %v9398_v4 = vpack.c.bf16 %v7944_v0, %v7943_v61 }
 0x602   :  { %v3839_v12 = vmul.f32 %v7903_v2, %v3833_v5  ;;  %v7949_v5 = vld [vmem:[%s10694_s2 + $0x2e0] sm:$0xff] }
 0x603   :  { %9485 = vrsqrt.f32 %v3830_v9  ;;  %v9407_v8 = vpack.c.bf16 %v7950_v6, %v7949_v5  ;;  %v7947_v9 = vld [vmem:[%s10694_s2 + $0x2d0] sm:$0xff] }
 0x604   :  { %v10179_v16 = vadd.f32 %v7904_v10, %v3839_v12  ;;  %v7951_v12 = vld [vmem:[%s10694_s2 + $0x2f0] sm:$0xff] }
 0x606   :  { %8762 = vmatmul.mubr.msk.f32.vlgmr.msra.gmra.mrb[46].mxu0 %vm181_vm1, %v10179_v16  ;;  %8773 = vmatmul.mubr.msk.f32.vlgmr.msra.gmra.mrb[50].mxu1 %vm181_vm1, %v10179_v16 }
 0x607   :  { %9306 = vmatpush3.bf16.msra.mxu0 %v9305_v13  ;;  %9312 = vmatpush3.bf16.msra.mxu1 %v9311_v14 }
 0x608   :  { %9307 = vmatprep.subr.bf16.mxu0 %v9557_v3  ;;  %9313 = vmatprep.subr.bf16.mxu1 %v9557_v3 }
 0x609   :  { %8783 = vmatprep.mubr.msk.f32.mxu0 %vm9558_vm0, %v9559_v11  ;;  %8794 = vmatprep.mubr.msk.f32.mxu1 %vm9558_vm0, %v9559_v11 }
 0x60b   :  { %9309 = vmatpush3.bf16.msra.mxu0 %v9308_v20  ;;  %9315 = vmatpush3.bf16.msra.mxu1 %v9314_v21 }
 0x60c   :  { %9316 = vmatprep.subr.bf16.mxu0 %v9557_v3  ;;  %9322 = vmatprep.subr.bf16.mxu1 %v9557_v3 }
 0x60d   :  { %v9486_v22 = vpop.eup %9485 }
 0x60e   :  { %v3834_v23 = vmul.f32 %v9486_v22, %v10125_v38  ;;  %8784 = vmatmul.mubr.msk.f32.vlgmr.msra.gmra.mrb[48].mxu0 %vm181_vm1, %v10179_v16  ;;  %8795 = vmatmul.mubr.msk.f32.vlgmr.msra.gmra.mrb[52].mxu1 %vm181_vm1, %v10179_v16  ;;  %v9359_v38 = vpack.c.bf16 %v7934_v36, %v7933_v35 }
 0x60f   :  { %9318 = vmatpush3.bf16.msra.mxu0 %v9293_v45  ;;  %9324 = vmatpush3.bf16.msra.mxu1 %v9299_v48  ;;  %v9356_v45 = vpack.c.bf16 %v7932_v40, %v7931_v39  ;;  %v10321_v48 = vld [vmem:[%s10693_s1 + $0x8] sm:$0xff] }
 0x610   :  { %9319 = vmatprep.subr.bf16.mxu0 %v9557_v3  ;;  %9325 = vmatprep.subr.bf16.mxu1 %v9557_v3  ;;  %v3840_v24 = vmul.f32 %v7903_v2, %v3834_v23  ;;  %v7946_v2 = vld [vmem:[%s10694_s2 + $0x2c8] sm:$0xff] }
 0x611   :  { %8805 = vmatprep.mubr.msk.f32.mxu0 %vm9558_vm0, %v9559_v11  ;;  %8816 = vmatprep.mubr.msk.f32.mxu1 %vm9558_vm0, %v9559_v11  ;;  %v9401_v7 = vpack.c.bf16 %v7946_v2, %v7945_v1 }
 0x612   :  { %v10213_v51 = vadd.f32 %v7904_v10, %v3840_v24  ;;  %v7948_v10 = vld [vmem:[%s10694_s2 + $0x2d8] sm:$0xff] }
 0x613   :  { %9321 = vmatpush3.bf16.msra.mxu0 %v9296_v53  ;;  %9327 = vmatpush3.bf16.msra.mxu1 %v9302_v56  ;;  %v7942_v53 = vld [vmem:[%s10694_s2 + $0x2a8] sm:$0xff] }
 0x614   :  { %9328 = vmatprep.subr.bf16.mxu0 %v9557_v3  ;;  %9334 = vmatprep.subr.bf16.mxu1 %v9557_v3  ;;  %v9395_v56 = vpack.c.bf16 %v7942_v53, %v7941_v52 }
 0x616   :  { %8806 = vmatmul.mubr.msk.f32.vlgmr.msra.gmra.mrb[50].mxu0 %vm181_vm1, %v10213_v51  ;;  %8817 = vmatmul.mubr.msk.f32.vlgmr.msra.gmra.mrb[54].mxu1 %vm181_vm1, %v10213_v51 }
 0x617   :  { %9330 = vmatpush3.bf16.msra.mxu0 %v9305_v13  ;;  %9336 = vmatpush3.bf16.msra.mxu1 %v9311_v14  ;;  %v9404_v13 = vpack.c.bf16 %v7948_v10, %v7947_v9  ;;  %v7952_v14 = vld [vmem:[%s10694_s2 + $0x2f8] sm:$0xff] }
 0x618   :  { %9331 = vmatprep.subr.bf16.mxu0 %v9557_v3  ;;  %9337 = vmatprep.subr.bf16.mxu1 %v9557_v3  ;;  %v9410_v15 = vpack.c.bf16 %v7952_v14, %v7951_v12 }
 0x619   :  { %8827 = vmatprep.mubr.msk.f32.mxu0 %vm9558_vm0, %v9559_v11  ;;  %8838 = vmatprep.mubr.msk.f32.mxu1 %vm9558_vm0, %v9559_v11 }
 0x61b   :  { %9333 = vmatpush3.bf16.msra.mxu0 %v9308_v20  ;;  %9339 = vmatpush3.bf16.msra.mxu1 %v9314_v21 }
 0x61c   :  { %9340 = vmatprep.subr.bf16.mxu0 %v9557_v3  ;;  %9346 = vmatprep.subr.bf16.mxu1 %v9557_v3 }
 0x61e   :  { %8828 = vmatmul.mubr.msk.f32.vlgmr.msra.gmra.mrb[52].mxu0 %vm181_vm1, %v10213_v51  ;;  %8839 = vmatmul.mubr.msk.f32.vlgmr.msra.gmra.mrb[56].mxu1 %vm181_vm1, %v10213_v51 }
 0x61f   :  { %9342 = vmatpush3.bf16.msra.mxu0 %v9341_v28  ;;  %9348 = vmatpush3.bf16.msra.mxu1 %v9347_v57 }
 0x620   :  { %9343 = vmatprep.subr.bf16.mxu0 %v9557_v3  ;;  %9349 = vmatprep.subr.bf16.mxu1 %v9557_v3 }
 0x621   :  { %8849 = vmatprep.mubr.msk.f32.mxu0 %vm9558_vm0, %v9559_v11  ;;  %8860 = vmatprep.mubr.msk.f32.mxu1 %vm9558_vm0, %v9559_v11 }
 0x623   :  { %9345 = vmatpush3.bf16.msra.mxu0 %v9344_v32  ;;  %9351 = vmatpush3.bf16.msra.mxu1 %v9350_v60 }
 0x624   :  { %9352 = vmatprep.subr.bf16.mxu0 %v9557_v3  ;;  %9358 = vmatprep.subr.bf16.mxu1 %v9557_v3 }
 0x626   :  { %8850 = vmatmul.mubr.msk.f32.vlgmr.msra.gmra.mrb[54].mxu0 %vm181_vm1, %v10292_v44  ;;  %8861 = vmatmul.mubr.msk.f32.vlgmr.msra.gmra.mrb[58].mxu1 %vm181_vm1, %v10292_v44 }
 0x627   :  { %9354 = vmatpush3.bf16.msra.mxu0 %v9353_v37  ;;  %9360 = vmatpush3.bf16.msra.mxu1 %v9359_v38 }
 0x628   :  { %9355 = vmatprep.subr.bf16.mxu0 %v9557_v3  ;;  %9361 = vmatprep.subr.bf16.mxu1 %v9557_v3 }
 0x629   :  { %8871 = vmatprep.mubr.msk.f32.mxu0 %vm9558_vm0, %v9559_v11  ;;  %8882 = vmatprep.mubr.msk.f32.mxu1 %vm9558_vm0, %v9559_v11 }
 0x62b   :  { %9357 = vmatpush3.bf16.msra.mxu0 %v9356_v45  ;;  %9363 = vmatpush3.bf16.msra.mxu1 %v9362_v46 }
 0x62c   :  { %9364 = vmatprep.subr.bf16.mxu0 %v9557_v3  ;;  %9370 = vmatprep.subr.bf16.mxu1 %v9557_v3 }
 0x62e   :  { %8872 = vmatmul.mubr.msk.f32.vlgmr.msra.gmra.mrb[56].mxu0 %vm181_vm1, %v10292_v44  ;;  %8883 = vmatmul.mubr.msk.f32.vlgmr.msra.gmra.mrb[60].mxu1 %vm181_vm1, %v10292_v44 }
 0x62f   :  { %9366 = vmatpush3.bf16.msra.mxu0 %v9341_v28  ;;  %9372 = vmatpush3.bf16.msra.mxu1 %v9347_v57  ;;  %v7954_v28 = vld.sshfl [vmem:[%s10695_s3 + $0xc] sm:$0x33 pattern:$0x75316420]  ;;  %v3935_v57 = vcombine.high %v7956_v47, %v7956_v47 }
 0x630   :  { %9367 = vmatprep.subr.bf16.mxu0 %v9557_v3  ;;  %9373 = vmatprep.subr.bf16.mxu1 %v9557_v3  ;;  %v3908_v29 = vcombine.high %v7954_v28, %v7954_v28  ;;  %v3915_v33 = vrot.slane %v7954_v28, %v9917_v34 }
 0x631   :  { %8893 = vmatprep.mubr.msk.f32.mxu0 %vm9558_vm0, %v9559_v11  ;;  %8904 = vmatprep.mubr.msk.f32.mxu1 %vm9558_vm0, %v9559_v11  ;;  %v3949_v63 = vrot.slane %v3935_v57, %v9917_v34 }
 0x632   :  { %v3922_v35 = vrot.slane %v3908_v29, %v9917_v34  ;;  %v3923_v50 = vcombine.high %v3915_v33, %v3915_v33 }
 0x633   :  { %9369 = vmatpush3.bf16.msra.mxu0 %v9344_v32  ;;  %9375 = vmatpush3.bf16.msra.mxu1 %v9350_v60  ;;  %v3942_v60 = vrot.slane %v7956_v47, %v9917_v34  ;;  %v3951_v49 = vcombine.high %v3949_v63, %v3949_v63 }
 0x634   :  { %9376 = vmatprep.subr.bf16.mxu0 %v9557_v3  ;;  %9382 = vmatprep.subr.bf16.mxu1 %v9557_v3  ;;  %v3986_v39 = vrot.slane %v3922_v35, %v9927_v42  ;;  %v3990_v59 = vrot.slane %v3923_v50, %v9927_v42 }
 0x635   :  { %v4568_v36 = vrot.slane %v3942_v60, %v9927_v42  ;;  %v4580_v58 = vrot.slane %v3951_v49, %v9927_v42 }
 0x636   :  { %8894 = vmatmul.mubr.msk.f32.vlgmr.msra.gmra.mrb[58].mxu0 %vm181_vm1, %v10321_v48  ;;  %8905 = vmatmul.mubr.msk.f32.vlgmr.msra.gmra.mrb[62].mxu1 %vm181_vm1, %v10321_v48 }
 0x637   :  { %9378 = vmatpush3.bf16.msra.mxu0 %v9353_v37  ;;  %9384 = vmatpush3.bf16.msra.mxu1 %v9359_v38  ;;  %v4572_v37 = vrot.slane %v3949_v63, %v9927_v42  ;;  %v3982_v38 = vrot.slane %v3915_v33, %v9927_v42 }
 0x638   :  { %9379 = vmatprep.subr.bf16.mxu0 %v9557_v3  ;;  %9385 = vmatprep.subr.bf16.mxu1 %v9557_v3 }
 0x639   :  { %8915 = vmatprep.mubr.msk.f32.mxu0 %vm9558_vm0, %v9559_v11  ;;  %8926 = vmatprep.mubr.msk.f32.mxu1 %vm9558_vm0, %v9559_v11 }
 0x63b   :  { %9381 = vmatpush3.bf16.msra.mxu0 %v9356_v45  ;;  %9387 = vmatpush3.bf16.msra.mxu1 %v9362_v46 }
 0x63c   :  { %9388 = vmatprep.subr.bf16.mxu0 %v9557_v3  ;;  %9394 = vmatprep.subr.bf16.mxu1 %v9557_v3 }
 0x63e   :  { %8916 = vmatmul.mubr.msk.f32.vlgmr.msra.gmra.mrb[60].mxu0 %vm181_vm1, %v10321_v48  ;;  %8927 = vmatmul.mubr.msk.f32.vlgmr.msra.gmra.mrb[64].mxu1 %vm181_vm1, %v10321_v48 }
 0x63f   :  { %9390 = vmatpush3.bf16.msra.mxu0 %v9389_v55  ;;  %9396 = vmatpush3.bf16.msra.mxu1 %v9395_v56 }
 0x640   :  { %9391 = vmatprep.subr.bf16.mxu0 %v9557_v3  ;;  %9397 = vmatprep.subr.bf16.mxu1 %v9557_v3 }
 0x641   :  { %8937 = vmatprep.mubr.msk.f32.mxu0 %vm9558_vm0, %v9559_v11  ;;  %8948 = vmatprep.mubr.msk.f32.mxu1 %vm9558_vm0, %v9559_v11 }
 0x643   :  { %9393 = vmatpush3.bf16.msra.mxu0 %v9392_v62  ;;  %9399 = vmatpush3.bf16.msra.mxu1 %v9398_v4 }
 0x644   :  { %9400 = vmatprep.subr.bf16.mxu0 %v9557_v3  ;;  %9406 = vmatprep.subr.bf16.mxu1 %v9557_v3 }
 0x646   :  { %8938 = vmatmul.mubr.msk.f32.vlgmr.msra.gmra.mrb[62].mxu0 %vm181_vm1, %v10292_v44  ;;  %8949 = vmatmul.mubr.msk.f32.vlgmr.msra.gmra.mrb[66].mxu1 %vm181_vm1, %v10292_v44 }
 0x647   :  { %9402 = vmatpush3.bf16.msra.mxu0 %v9401_v7  ;;  %9408 = vmatpush3.bf16.msra.mxu1 %v9407_v8 }
 0x648   :  { %9403 = vmatprep.subr.bf16.mxu0 %v9557_v3  ;;  %9409 = vmatprep.subr.bf16.mxu1 %v9557_v3 }
 0x649   :  { %8959 = vmatprep.mubr.msk.f32.mxu0 %vm9558_vm0, %v9559_v11  ;;  %8970 = vmatprep.mubr.msk.f32.mxu1 %vm9558_vm0, %v9559_v11 }
 0x64b   :  { %9405 = vmatpush3.bf16.msra.mxu0 %v9404_v13  ;;  %9411 = vmatpush3.bf16.msra.mxu1 %v9410_v15 }
 0x64c   :  { %9412 = vmatprep.subr.bf16.mxu0 %v9557_v3  ;;  %9418 = vmatprep.subr.bf16.mxu1 %v9557_v3 }
 0x64e   :  { %8960 = vmatmul.mubr.msk.f32.vlgmr.msra.gmra.mrb[64].mxu0 %vm181_vm1, %v10292_v44  ;;  %8971 = vmatmul.mubr.msk.f32.vlgmr.msra.gmra.mrb[68].mxu1 %vm181_vm1, %v10292_v44 }
 0x64f   :  { %9414 = vmatpush3.bf16.msra.mxu0 %v9389_v55  ;;  %9420 = vmatpush3.bf16.msra.mxu1 %v9395_v56  ;;  %v3924_v55 = vcombine.high %v3922_v35, %v3922_v35 }
 0x650   :  { %9415 = vmatprep.subr.bf16.mxu0 %v9557_v3  ;;  %9421 = vmatprep.subr.bf16.mxu1 %v9557_v3 }
 0x651   :  { %8981 = vmatprep.mubr.msk.f32.mxu0 %vm9558_vm0, %v9559_v11  ;;  %8992 = vmatprep.mubr.msk.f32.mxu1 %vm9558_vm0, %v9559_v11  ;;  %v3994_v61 = vrot.slane %v3924_v55, %v9927_v42 }
 0x653   :  { %9417 = vmatpush3.bf16.msra.mxu0 %v9392_v62  ;;  %9423 = vmatpush3.bf16.msra.mxu1 %v9398_v4 }
 0x654   :  { %9424 = vmatprep.subr.bf16.mxu0 %v9557_v3  ;;  %9430 = vmatprep.subr.bf16.mxu1 %v9557_v3 }
 0x656   :  { %8982 = vmatmul.mubr.msk.f32.vlgmr.msra.gmra.mrb[66].mxu0 %vm181_vm1, %v10321_v48  ;;  %8993 = vmatmul.mubr.msk.f32.vlgmr.msra.gmra.mrb[70].mxu1 %vm181_vm1, %v10321_v48 }
 0x657   :  { %9426 = vmatpush3.bf16.msra.mxu0 %v9401_v7  ;;  %9432 = vmatpush3.bf16.msra.mxu1 %v9407_v8 }
 0x658   :  { %9427 = vmatprep.subr.bf16.mxu0 %v9557_v3  ;;  %9433 = vmatprep.subr.bf16.mxu1 %v9557_v3 }
 0x659   :  { %9003 = vmatprep.mubr.msk.f32.mxu0 %vm9558_vm0, %v9559_v11  ;;  %9014 = vmatprep.mubr.msk.f32.mxu1 %vm9558_vm0, %v9559_v11 }
 0x65b   :  { %9429 = vmatpush3.bf16.msra.mxu0 %v9404_v13  ;;  %9435 = vmatpush3.bf16.msra.mxu1 %v9410_v15 }
 0x65c   :  { %9017 = vmatprep.subr.mxu0 %v9559_v11  ;;  %9022 = vmatprep.subr.mxu1 %v9559_v11 }
 0x65e   :  { %9004 = vmatmul.mubr.msk.f32.vlgmr.msra.gmra.mrb[68].mxu0 %vm181_vm1, %v10321_v48  ;;  %9015 = vmatmul.mubr.msk.f32.vlgmr.msra.gmra.mrb[72].mxu1 %vm181_vm1, %v10321_v48  ;;  %v3950_v48 = vcombine.high %v3942_v60, %v3942_v60 }
 0x65f   :  { %9019 = vmatprep.mubr.msk.f32.mxu0 %vm9558_vm0, %v9559_v11  ;;  %9024 = vmatprep.mubr.msk.f32.mxu1 %vm9558_vm0, %v9559_v11 }
 0x660   :  { %v4576_v56 = vrot.slane %v3950_v48, %v9927_v42 }
 0x6d9   :  { %v4068_v3 = vpop.f32.mrb[46].mxu0  ;;  %v4138_v17 = vpop.f32.mrb[50].mxu1 }
 0x6da   :  { %v8763_v18 = vpop.f32.mrb[47].mxu0  ;;  %v8774_v19 = vpop.f32.mrb[51].mxu1  ;;  %v4069_v52 = vadd.f32 %v4068_v3, %v3982_v38  ;;  %v4139_v53 = vadd.f32 %v4138_v17, %v3986_v39 }
 0x6e1   :  { %v4208_v20 = vpop.f32.mrb[48].mxu0  ;;  %v4278_v21 = vpop.f32.mrb[52].mxu1 }
 0x6e2   :  { %v8785_v22 = vpop.f32.mrb[49].mxu0  ;;  %v8796_v23 = vpop.f32.mrb[53].mxu1  ;;  %v4209_v6 = vadd.f32 %v4208_v20, %v3990_v59  ;;  %v4279_v7 = vadd.f32 %v4278_v21, %v3994_v61 }
 0x6e9   :  { %v10439_v24 = vpop.f32.mrb[50].mxu0  ;;  %v10441_v25 = vpop.f32.mrb[54].mxu1 }
 0x6ea   :  { %v8807_v26 = vpop.f32.mrb[51].mxu0  ;;  %v8818_v27 = vpop.f32.mrb[55].mxu1  ;;  %v4352_v15 = vadd.f32 %v10439_v24, %v3982_v38  ;;  %v4422_v3 = vadd.f32 %v10441_v25, %v3986_v39  ;;  %v7958_v25 = vld.sshfl [vmem:[%s10695_s3 + $0x14] sm:$0x33 pattern:$0x75316420] }
 0x6eb   :  { %v3962_v26 = vcombine.high %v7958_v25, %v7958_v25  ;;  %v3969_v27 = vrot.slane %v7958_v25, %v9917_v34 }
 0x6ed   :  { %v3976_v47 = vrot.slane %v3962_v26, %v9917_v34  ;;  %v5148_v28 = vrot.slane %v3969_v27, %v9927_v42 }
 0x6ef   :  { %v5152_v57 = vrot.slane %v3976_v47, %v9927_v42  ;;  %v3978_v33 = vcombine.high %v3976_v47, %v3976_v47 }
 0x6f1   :  { %v10449_v54 = vpop.f32.mrb[52].mxu0  ;;  %v10451_v30 = vpop.f32.mrb[56].mxu1  ;;  %v5160_v34 = vrot.slane %v3978_v33, %v9927_v42 }
 0x6f2   :  { %v8829_v31 = vpop.f32.mrb[53].mxu0  ;;  %v8840_v32 = vpop.f32.mrb[57].mxu1  ;;  %v4492_v23 = vadd.f32 %v10449_v54, %v3990_v59  ;;  %v4562_v24 = vadd.f32 %v10451_v30, %v3994_v61 }
 0x6f3   :  { %v3977_v32 = vcombine.high %v3969_v27, %v3969_v27 }
 0x6f5   :  { %v5156_v35 = vrot.slane %v3977_v32, %v9927_v42 }
 0x6f9   :  { %v4651_v40 = vpop.f32.mrb[54].mxu0  ;;  %v4721_v41 = vpop.f32.mrb[58].mxu1 }
 0x6fa   :  { %v4652_v43 = vadd.f32 %v4651_v40, %v4568_v36  ;;  %v4722_v44 = vadd.f32 %v4721_v41, %v4572_v37  ;;  %v8851_v45 = vpop.f32.mrb[55].mxu0  ;;  %v8862_v46 = vpop.f32.mrb[59].mxu1 }
 0x6fc   :  { %9018 = vmatpush3.xpose.msk.msra.mxu0 %vm1914_vm2, %v4652_v43  ;;  %9023 = vmatpush3.xpose.msk.msra.mxu1 %vm1914_vm2, %v4722_v44 }
 0x6fd   :  { %9027 = vmatprep.subr.mxu0 %v9559_v11  ;;  %9032 = vmatprep.subr.mxu1 %v9559_v11 }
 0x6ff   :  { %9020 = vmatmul.mubr.msk.f32.vlgmr.msra.gmra.mrb[70].mxu0 %vm1914_vm2, %v4069_v52  ;;  %9025 = vmatmul.mubr.msk.f32.vlgmr.msra.gmra.mrb[74].mxu1 %vm1914_vm2, %v4139_v53 }
 0x700   :  { %9029 = vmatprep.mubr.msk.f32.mxu0 %vm9558_vm0, %v9559_v11  ;;  %9034 = vmatprep.mubr.msk.f32.mxu1 %vm9558_vm0, %v9559_v11 }
 0x701   :  { %v4791_v62 = vpop.f32.mrb[56].mxu0  ;;  %v4861_v0 = vpop.f32.mrb[60].mxu1 }
 0x702   :  { %v4792_v1 = vadd.f32 %v4791_v62, %v4576_v56  ;;  %v4862_v2 = vadd.f32 %v4861_v0, %v4580_v58  ;;  %v8873_v4 = vpop.f32.mrb[57].mxu0  ;;  %v8884_v5 = vpop.f32.mrb[61].mxu1 }
 0x704   :  { %9028 = vmatpush3.xpose.msk.msra.mxu0 %vm1914_vm2, %v4792_v1  ;;  %9033 = vmatpush3.xpose.msk.msra.mxu1 %vm1914_vm2, %v4862_v2 }
 0x705   :  { %9037 = vmatprep.subr.mxu0 %v9559_v11  ;;  %9042 = vmatprep.subr.mxu1 %v9559_v11 }
 0x707   :  { %9030 = vmatmul.mubr.msk.f32.vlgmr.msra.gmra.mrb[72].mxu0 %vm1914_vm2, %v4209_v6  ;;  %9035 = vmatmul.mubr.msk.f32.vlgmr.msra.gmra.mrb[76].mxu1 %vm1914_vm2, %v4279_v7 }
 0x708   :  { %9039 = vmatprep.mubr.msk.f32.mxu0 %vm9558_vm0, %v9559_v11  ;;  %9044 = vmatprep.mubr.msk.f32.mxu1 %vm9558_vm0, %v9559_v11 }
 0x709   :  { %v4931_v8 = vpop.f32.mrb[58].mxu0  ;;  %v5001_v9 = vpop.f32.mrb[62].mxu1 }
 0x70a   :  { %v4932_v10 = vadd.f32 %v4931_v8, %v4568_v36  ;;  %v5002_v12 = vadd.f32 %v5001_v9, %v4572_v37  ;;  %v8895_v13 = vpop.f32.mrb[59].mxu0  ;;  %v8906_v14 = vpop.f32.mrb[63].mxu1 }
 0x70c   :  { %9038 = vmatpush3.xpose.msk.msra.mxu0 %vm1914_vm2, %v4932_v10  ;;  %9043 = vmatpush3.xpose.msk.msra.mxu1 %vm1914_vm2, %v5002_v12 }
 0x70d   :  { %9047 = vmatprep.subr.mxu0 %v9559_v11  ;;  %9052 = vmatprep.subr.mxu1 %v9559_v11 }
 0x70f   :  { %9040 = vmatmul.mubr.msk.f32.vlgmr.msra.gmra.mrb[74].mxu0 %vm1914_vm2, %v4352_v15  ;;  %9045 = vmatmul.mubr.msk.f32.vlgmr.msra.gmra.mrb[78].mxu1 %vm1914_vm2, %v4422_v3 }
 0x710   :  { %9049 = vmatprep.mubr.msk.f32.mxu0 %vm9558_vm0, %v9559_v11  ;;  %9054 = vmatprep.mubr.msk.f32.mxu1 %vm9558_vm0, %v9559_v11 }
 0x711   :  { %v5071_v17 = vpop.f32.mrb[60].mxu0  ;;  %v5141_v18 = vpop.f32.mrb[64].mxu1 }
 0x712   :  { %v5072_v19 = vadd.f32 %v5071_v17, %v4576_v56  ;;  %v5142_v20 = vadd.f32 %v5141_v18, %v4580_v58  ;;  %v8917_v21 = vpop.f32.mrb[61].mxu0  ;;  %v8928_v22 = vpop.f32.mrb[65].mxu1 }
 0x714   :  { %9048 = vmatpush3.xpose.msk.msra.mxu0 %vm1914_vm2, %v5072_v19  ;;  %9053 = vmatpush3.xpose.msk.msra.mxu1 %vm1914_vm2, %v5142_v20 }
 0x715   :  { %9057 = vmatprep.subr.mxu0 %v9559_v11  ;;  %9062 = vmatprep.subr.mxu1 %v9559_v11 }
 0x717   :  { %9050 = vmatmul.mubr.msk.f32.vlgmr.msra.gmra.mrb[76].mxu0 %vm1914_vm2, %v4492_v23  ;;  %9055 = vmatmul.mubr.msk.f32.vlgmr.msra.gmra.mrb[80].mxu1 %vm1914_vm2, %v4562_v24 }
 0x718   :  { %9059 = vmatprep.mubr.msk.f32.mxu0 %vm9558_vm0, %v9559_v11  ;;  %9064 = vmatprep.mubr.msk.f32.mxu1 %vm9558_vm0, %v9559_v11 }
 0x719   :  { %v5231_v29 = vpop.f32.mrb[62].mxu0  ;;  %v5301_v31 = vpop.f32.mrb[66].mxu1 }
 0x71a   :  { %v5232_v54 = vadd.f32 %v5231_v29, %v5148_v28  ;;  %v8939_v30 = vpop.f32.mrb[63].mxu0  ;;  %v5302_v60 = vadd.f32 %v5301_v31, %v5152_v57  ;;  %v8950_v63 = vpop.f32.mrb[67].mxu1 }
 0x71c   :  { %9058 = vmatpush3.msra.mxu0 %v5232_v54  ;;  %9063 = vmatpush3.msra.mxu1 %v5302_v60 }
 0x71d   :  { %9067 = vmatprep.subr.mxu0 %v9559_v11  ;;  %9072 = vmatprep.subr.mxu1 %v9559_v11 }
 0x721   :  { %v5371_v36 = vpop.f32.mrb[64].mxu0  ;;  %v5441_v39 = vpop.f32.mrb[68].mxu1 }
 0x722   :  { %v10520_v37 = vadd.f32 %v5371_v36, %v5156_v35  ;;  %v8961_v38 = vpop.f32.mrb[65].mxu0  ;;  %v10522_v40 = vadd.f32 %v5441_v39, %v5160_v34  ;;  %v8972_v41 = vpop.f32.mrb[69].mxu1 }
 0x729   :  { %v5511_v43 = vpop.f32.mrb[66].mxu0  ;;  %v5581_v46 = vpop.f32.mrb[70].mxu1 }
 0x72a   :  { %v10524_v44 = vadd.f32 %v5511_v43, %v5148_v28  ;;  %v8983_v45 = vpop.f32.mrb[67].mxu0  ;;  %v10526_v48 = vadd.f32 %v5581_v46, %v5152_v57  ;;  %v8994_v49 = vpop.f32.mrb[71].mxu1 }
 0x731   :  { %v5651_v50 = vpop.f32.mrb[68].mxu0  ;;  %v5721_v42 = vpop.f32.mrb[72].mxu1 }
 0x732   :  { %v10528_v52 = vadd.f32 %v5651_v50, %v5156_v35  ;;  %v9005_v53 = vpop.f32.mrb[69].mxu0  ;;  %v10530_v55 = vadd.f32 %v5721_v42, %v5160_v34  ;;  %v9016_v56 = vpop.f32.mrb[73].mxu1 }
 0x7d2   :  { %v5797_v58 = vpop.f32.mrb[70].mxu0  ;;  %v5873_v59 = vpop.f32.mrb[74].mxu1 }
 0x7d3   :  { %v9021_v61 = vpop.f32.mrb[71].mxu0  ;;  %v9026_v62 = vpop.f32.mrb[75].mxu1  ;;  %v6336_v0 = vsel %vm1914_vm2, %v5873_v59, -inf  ;;  %v6333_v1 = vsel %vm1914_vm2, %v5797_v58, -inf }
 0x7d4   :  { %6337 = vmax.xlane.f32.xlu1 %v6336_v0  ;;  %6334 = vmax.xlane.f32.xlu0 %v6333_v1 }
 0x7da   :  { %v5949_v2 = vpop.f32.mrb[72].mxu0  ;;  %v6025_v4 = vpop.f32.mrb[76].mxu1 }
 0x7db   :  { %v9031_v5 = vpop.f32.mrb[73].mxu0  ;;  %v9036_v6 = vpop.f32.mrb[77].mxu1  ;;  %v6342_v7 = vsel %vm1914_vm2, %v6025_v4, -inf  ;;  %v6339_v8 = vsel %vm1914_vm2, %v5949_v2, -inf }
 0x7dc   :  { %6343 = vmax.xlane.f32.xlu1 %v6342_v7  ;;  %6340 = vmax.xlane.f32.xlu0 %v6339_v8 }
 0x7e2   :  { %v6101_v9 = vpop.f32.mrb[74].mxu0  ;;  %v6177_v10 = vpop.f32.mrb[78].mxu1 }
 0x7e3   :  { %v9041_v12 = vpop.f32.mrb[75].mxu0  ;;  %v9046_v13 = vpop.f32.mrb[79].mxu1  ;;  %v6348_v14 = vsel %vm1914_vm2, %v6177_v10, -inf  ;;  %v6345_v15 = vsel %vm1914_vm2, %v6101_v9, -inf }
 0x7e4   :  { %6349 = vmax.xlane.f32.xlu1 %v6348_v14  ;;  %6346 = vmax.xlane.f32.xlu0 %v6345_v15 }
 0x7ea   :  { %v6253_v3 = vpop.f32.mrb[76].mxu0  ;;  %v6329_v17 = vpop.f32.mrb[80].mxu1 }
 0x7eb   :  { %v9051_v18 = vpop.f32.mrb[77].mxu0  ;;  %v9056_v19 = vpop.f32.mrb[81].mxu1  ;;  %v6354_v20 = vsel %vm1914_vm2, %v6329_v17, -inf  ;;  %v6351_v21 = vsel %vm1914_vm2, %v6253_v3, -inf }
 0x7ec   :  { %6355 = vmax.xlane.f32.xlu1 %v6354_v20  ;;  %6352 = vmax.xlane.f32.xlu0 %v6351_v21 }
 0x861   :  { %v6338_v22 = vpop.xlane.xlu1 %6337  ;;  %v6335_v23 = vpop.xlane.xlu0 %6334 }
 0x862   :  { %v6358_v24 = vsub.f32 %v5873_v59, %v6338_v22  ;;  %v6357_v25 = vsub.f32 %v5797_v58, %v6335_v23 }
 0x864   :  { %v6367_v26 = vmul.f32 1.442695, %v6358_v24  ;;  %v6365_v27 = vmul.f32 1.442695, %v6357_v25 }
 0x866   :  { %9487 = vpow2.f32 %v6367_v26 }
 0x867   :  { %9489 = vpow2.f32 %v6365_v27  ;;  %v8010_v27 = vld [vmem:[%s10696_s4 + $0x38] sm:$0xff] }
 0x869   :  { %v6344_v47 = vpop.xlane.xlu1 %6343  ;;  %v6341_v28 = vpop.xlane.xlu0 %6340 }
 0x86a   :  { %v6360_v57 = vsub.f32 %v6025_v4, %v6344_v47  ;;  %v6359_v29 = vsub.f32 %v5949_v2, %v6341_v28  ;;  %v8009_v28 = vld [vmem:[%s10696_s4 + $0x30] sm:$0xff] }
 0x86c   :  { %v6371_v54 = vmul.f32 1.442695, %v6360_v57  ;;  %v6369_v30 = vmul.f32 1.442695, %v6359_v29 }
 0x86e   :  { %9491 = vpow2.f32 %v6371_v54 }
 0x86f   :  { %9493 = vpow2.f32 %v6369_v30 }
 0x870   :  { %v9488_v31 = vpop.eup %9487 }
 0x871   :  { %v9490_v32 = vpop.eup %9489  ;;  %v6350_v60 = vpop.xlane.xlu1 %6349  ;;  %v6384_v33 = vsel %vm1914_vm2, %v9488_v31, 0.0 }
 0x872   :  { %v6347_v63 = vpop.xlane.xlu0 %6346  ;;  %v6362_v35 = vsub.f32 %v6177_v10, %v6350_v60  ;;  %6385 = vadd.xlane.f32.xlu1 %v6384_v33  ;;  %v6381_v36 = vsel %vm1914_vm2, %v9490_v32, 0.0 }
 0x873   :  { %v6361_v34 = vsub.f32 %v6101_v9, %v6347_v63  ;;  %6382 = vadd.xlane.f32.xlu0 %v6381_v36 }
 0x874   :  { %v6375_v38 = vmul.f32 1.442695, %v6362_v35 }
 0x875   :  { %v6373_v39 = vmul.f32 1.442695, %v6361_v34 }
 0x876   :  { %9495 = vpow2.f32 %v6375_v38 }
 0x877   :  { %9497 = vpow2.f32 %v6373_v39 }
 0x878   :  { %v9492_v41 = vpop.eup %9491 }
 0x879   :  { %v9494_v43 = vpop.eup %9493  ;;  %v6356_v45 = vpop.xlane.xlu1 %6355  ;;  %v6390_v49 = vsel %vm1914_vm2, %v9492_v41, 0.0 }
 0x87a   :  { %v6353_v46 = vpop.xlane.xlu0 %6352  ;;  %v6364_v50 = vsub.f32 %v6329_v17, %v6356_v45  ;;  %6391 = vadd.xlane.f32.xlu1 %v6390_v49  ;;  %v6387_v53 = vsel %vm1914_vm2, %v9494_v43, 0.0 }
 0x87b   :  { %v6363_v42 = vsub.f32 %v6253_v3, %v6353_v46  ;;  %6388 = vadd.xlane.f32.xlu0 %v6387_v53 }
 0x87c   :  { %v6379_v56 = vmul.f32 1.442695, %v6364_v50 }
 0x87d   :  { %v6377_v58 = vmul.f32 1.442695, %v6363_v42 }
 0x87e   :  { %9499 = vpow2.f32 %v6379_v56 }
 0x87f   :  { %9501 = vpow2.f32 %v6377_v58 }
 0x880   :  { %v9496_v59 = vpop.eup %9495 }
 0x881   :  { %v9498_v61 = vpop.eup %9497  ;;  %v6396_v62 = vsel %vm1914_vm2, %v9496_v59, 0.0 }
 0x882   :  { %6397 = vadd.xlane.f32.xlu1 %v6396_v62  ;;  %v6393_v0 = vsel %vm1914_vm2, %v9498_v61, 0.0 }
 0x883   :  { %6394 = vadd.xlane.f32.xlu0 %v6393_v0 }
 0x888   :  { %v9500_v1 = vpop.eup %9499 }
 0x889   :  { %v9502_v2 = vpop.eup %9501  ;;  %v6402_v4 = vsel %vm1914_vm2, %v9500_v1, 0.0 }
 0x88a   :  { %6403 = vadd.xlane.f32.xlu1 %v6402_v4  ;;  %v6399_v5 = vsel %vm1914_vm2, %v9502_v2, 0.0 }
 0x88b   :  { %6400 = vadd.xlane.f32.xlu0 %v6399_v5 }
 0x8ff   :  { %v6386_v6 = vpop.xlane.xlu1 %6385 }
 0x900   :  { %9503 = vrcp.f32 %v6386_v6  ;;  %v6383_v7 = vpop.xlane.xlu0 %6382 }
 0x901   :  { %9505 = vrcp.f32 %v6383_v7 }
 0x907   :  { %v6392_v8 = vpop.xlane.xlu1 %6391 }
 0x908   :  { %9507 = vrcp.f32 %v6392_v8  ;;  %v6389_v9 = vpop.xlane.xlu0 %6388 }
 0x909   :  { %9509 = vrcp.f32 %v6389_v9 }
 0x90a   :  { %v9504_v10 = vpop.eup %9503 }
 0x90b   :  { %v9506_v12 = vpop.eup %9505  ;;  %v6408_v13 = vmul.f32 %v9504_v10, %v9488_v31 }
 0x90c   :  { %v6406_v14 = vmul.f32 %v9506_v12, %v9490_v32 }
 0x90d   :  { %9065 = vmatmul.mubr.msk.f32.vlgmr.msra.gmra.mrb[82].mxu1 %vm1914_vm2, %v6408_v13 }
 0x90e   :  { %9060 = vmatmul.mubr.msk.f32.vlgmr.msra.gmra.mrb[78].mxu0 %vm1914_vm2, %v6406_v14  ;;  %9073 = vmatpush3.msra.mxu1 %v10522_v40 }
 0x90f   :  { %9068 = vmatpush3.msra.mxu0 %v10520_v37  ;;  %v6398_v15 = vpop.xlane.xlu1 %6397  ;;  %9069 = vmatprep.mubr.msk.f32.mxu0 %vm9558_vm0, %v9559_v11 }
 0x910   :  { %9511 = vrcp.f32 %v6398_v15  ;;  %v6395_v3 = vpop.xlane.xlu0 %6394  ;;  %9074 = vmatprep.mubr.msk.f32.mxu1 %vm9558_vm0, %v9559_v11  ;;  %9077 = vmatprep.subr.mxu0 %v9559_v11 }
 0x911   :  { %9513 = vrcp.f32 %v6395_v3  ;;  %9082 = vmatprep.subr.mxu1 %v9559_v11 }
 0x912   :  { %v9508_v17 = vpop.eup %9507 }
 0x913   :  { %v9510_v18 = vpop.eup %9509  ;;  %v6412_v19 = vmul.f32 %v9508_v17, %v9492_v41 }
 0x914   :  { %v6410_v40 = vmul.f32 %v9510_v18, %v9494_v43 }
 0x915   :  { %9075 = vmatmul.mubr.msk.f32.vlgmr.msra.gmra.mrb[84].mxu1 %vm1914_vm2, %v6412_v19 }
 0x916   :  { %9070 = vmatmul.mubr.msk.f32.vlgmr.msra.gmra.mrb[80].mxu0 %vm1914_vm2, %v6410_v40  ;;  %9083 = vmatpush3.msra.mxu1 %v10526_v48 }
 0x917   :  { %9078 = vmatpush3.msra.mxu0 %v10524_v44  ;;  %v6404_v37 = vpop.xlane.xlu1 %6403  ;;  %9079 = vmatprep.mubr.msk.f32.mxu0 %vm9558_vm0, %v9559_v11 }
 0x918   :  { %9515 = vrcp.f32 %v6404_v37  ;;  %v6401_v20 = vpop.xlane.xlu0 %6400  ;;  %9084 = vmatprep.mubr.msk.f32.mxu1 %vm9558_vm0, %v9559_v11  ;;  %9087 = vmatprep.subr.mxu0 %v9559_v11 }
 0x919   :  { %9517 = vrcp.f32 %v6401_v20  ;;  %9092 = vmatprep.subr.mxu1 %v9559_v11 }
 0x91a   :  { %v9512_v21 = vpop.eup %9511 }
 0x91b   :  { %v9514_v22 = vpop.eup %9513  ;;  %v6416_v23 = vmul.f32 %v9512_v21, %v9496_v59 }
 0x91c   :  { %v6414_v48 = vmul.f32 %v9514_v22, %v9498_v61 }
 0x91d   :  { %9085 = vmatmul.mubr.msk.f32.vlgmr.msra.gmra.mrb[86].mxu1 %vm1914_vm2, %v6416_v23 }
 0x91e   :  { %9080 = vmatmul.mubr.msk.f32.vlgmr.msra.gmra.mrb[82].mxu0 %vm1914_vm2, %v6414_v48  ;;  %9093 = vmatpush3.msra.mxu1 %v10530_v55  ;;  %v8008_v55 = vld [vmem:[%s10696_s4 + $0x28] sm:$0xff] }
 0x91f   :  { %9088 = vmatpush3.msra.mxu0 %v10528_v52  ;;  %9089 = vmatprep.mubr.msk.f32.mxu0 %vm9558_vm0, %v9559_v11  ;;  %v8007_v52 = vld [vmem:[%s10696_s4 + $0x20] sm:$0xff] }
 0x920   :  { %9094 = vmatprep.mubr.msk.f32.mxu1 %vm9558_vm0, %v9559_v11  ;;  %9097 = vmatprep.subr.mxu0 %v9559_v11 }
 0x921   :  { %9102 = vmatprep.subr.mxu1 %v9559_v11 }
 0x922   :  { %v9516_v44 = vpop.eup %9515 }
 0x923   :  { %v9518_v24 = vpop.eup %9517  ;;  %v6420_v25 = vmul.f32 %v9516_v44, %v9500_v1  ;;  %v8019_v1 = vld [vmem:[%s10698_s6 + $0x3] ss:$0 sm:$0xff] }
 0x924   :  { %v6418_v26 = vmul.f32 %v9518_v24, %v9502_v2 }
 0x925   :  { %9095 = vmatmul.mubr.msk.f32.vlgmr.msra.gmra.mrb[88].mxu1 %vm1914_vm2, %v6420_v25 }
 0x926   :  { %9090 = vmatmul.mubr.msk.f32.vlgmr.msra.gmra.mrb[84].mxu0 %vm1914_vm2, %v6418_v26  ;;  %9104 = vmatprep.mubr.msk.f32.mxu1 %vm9558_vm0, %v9559_v11 }
 0x927   :  { %9099 = vmatprep.mubr.msk.f32.mxu0 %vm9558_vm0, %v9559_v11  ;;  %9098 = vmatpush3.msra.mxu0 %v8007_v52 }
 0x928   :  { %9103 = vmatpush3.msra.mxu1 %v8008_v55  ;;  %9107 = vmatprep.subr.mxu0 %v9559_v11 }
 0x929   :  { %9112 = vmatprep.subr.mxu1 %v9559_v11 }
 0x9e0   :  { %v6563_v47 = vpop.f32.mrb[82].mxu1 }
 0x9e1   :  { %v6490_v57 = vpop.f32.mrb[78].mxu0  ;;  %v9066_v29 = vpop.f32.mrb[83].mxu1  ;;  %9105 = vmatmul.mubr.msk.f32.vlgmr.msra.gmra.mrb[90].mxu1 %vm1914_vm2, %v6563_v47 }
 0x9e2   :  { %v9061_v54 = vpop.f32.mrb[79].mxu0  ;;  %9100 = vmatmul.mubr.msk.f32.vlgmr.msra.gmra.mrb[86].mxu0 %vm1914_vm2, %v6490_v57  ;;  %9113 = vmatpush3.msra.mxu1 %v8010_v27  ;;  %v7659_v29 = vld [vmem:[%s10697_s5 + $0x10] sm:$0xff] }
 0x9e3   :  { %9108 = vmatpush3.msra.mxu0 %v8009_v28  ;;  %9109 = vmatprep.mubr.msk.f32.mxu0 %vm9558_vm0, %v9559_v11  ;;  %v7660_v54 = vld [vmem:[%s10697_s5 + $0x18] sm:$0xff] }
 0x9e4   :  { %9114 = vmatprep.mubr.msk.f32.mxu1 %vm9558_vm0, %v9559_v11  ;;  %9117 = vmatprep.subr.mxu0 %v9559_v11 }
 0x9e5   :  { %9122 = vmatprep.subr.mxu1 %v9559_v11 }
 0x9e8   :  { %v6709_v30 = vpop.f32.mrb[84].mxu1 }
 0x9e9   :  { %v6636_v31 = vpop.f32.mrb[80].mxu0  ;;  %v9076_v32 = vpop.f32.mrb[85].mxu1  ;;  %9115 = vmatmul.mubr.msk.f32.vlgmr.msra.gmra.mrb[92].mxu1 %vm1914_vm2, %v6709_v30  ;;  %v9440_v30 = vpack.c.bf16 %v7660_v54, %v7659_v29 }
 0x9ea   :  { %v9071_v60 = vpop.f32.mrb[81].mxu0  ;;  %9110 = vmatmul.mubr.msk.f32.vlgmr.msra.gmra.mrb[88].mxu0 %vm1914_vm2, %v6636_v31  ;;  %9123 = vmatpush3.msra.mxu1 %v8008_v55 }
 0x9eb   :  { %9118 = vmatpush3.msra.mxu0 %v8007_v52  ;;  %9119 = vmatprep.mubr.msk.f32.mxu0 %vm9558_vm0, %v9559_v11 }
 0x9ec   :  { %9124 = vmatprep.mubr.msk.f32.mxu1 %vm9558_vm0, %v9559_v11  ;;  %9127 = vmatprep.subr.mxu0 %v9559_v11 }
 0x9ed   :  { %9132 = vmatprep.subr.mxu1 %v9559_v11 }
 0x9f0   :  { %v6855_v63 = vpop.f32.mrb[86].mxu1 }
 0x9f1   :  { %v6782_v33 = vpop.f32.mrb[82].mxu0  ;;  %v9086_v35 = vpop.f32.mrb[87].mxu1  ;;  %9125 = vmatmul.mubr.msk.f32.vlgmr.msra.gmra.mrb[94].mxu1 %vm1914_vm2, %v6855_v63 }
 0x9f2   :  { %v9081_v34 = vpop.f32.mrb[83].mxu0  ;;  %9120 = vmatmul.mubr.msk.f32.vlgmr.msra.gmra.mrb[90].mxu0 %vm1914_vm2, %v6782_v33  ;;  %9133 = vmatpush3.msra.mxu1 %v8010_v27  ;;  %v8020_v33 = vld [vmem:[%s10698_s6 + $0x4] ss:$0 sm:$0xff] }
 0x9f3   :  { %9128 = vmatpush3.msra.mxu0 %v8009_v28  ;;  %9129 = vmatprep.mubr.msk.f32.mxu0 %vm9558_vm0, %v9559_v11  ;;  %v7658_v28 = vld [vmem:[%s10697_s5 + $0x8] sm:$0xff] }
 0x9f4   :  { %9134 = vmatprep.mubr.msk.f32.mxu1 %vm9558_vm0, %v9559_v11 }
 0x9f8   :  { %v7001_v36 = vpop.f32.mrb[88].mxu1 }
 0x9f9   :  { %v6928_v38 = vpop.f32.mrb[84].mxu0  ;;  %v9096_v39 = vpop.f32.mrb[89].mxu1  ;;  %9135 = vmatmul.mubr.msk.f32.vlgmr.msra.gmra.mrb[96].mxu1 %vm1914_vm2, %v7001_v36 }
 0x9fa   :  { %v9091_v41 = vpop.f32.mrb[85].mxu0  ;;  %9130 = vmatmul.mubr.msk.f32.vlgmr.msra.gmra.mrb[92].mxu0 %vm1914_vm2, %v6928_v38  ;;  %v8021_v38 = vld [vmem:[%s10698_s6 + $0x5] ss:$0 sm:$0xff] }
 0xab4   :  { %v7152_v43 = vpop.f32.mrb[90].mxu1 }
 0xab5   :  { %v7079_v45 = vpop.f32.mrb[86].mxu0  ;;  %v7595_v46 = vsel %vm181_vm1, %v7152_v43, 0.0  ;;  %v9106_v49 = vpop.f32.mrb[91].mxu1 }
 0xab6   :  { %v7594_v50 = vsel %vm181_vm1, %v7079_v45, 0.0  ;;  %v9101_v42 = vpop.f32.mrb[87].mxu0 }
 0xab7   :  { %v7596_v53 = vadd.f32 %v7595_v46, %v7594_v50  ;;  %v8024_v42 = vld [vmem:[%s10698_s6 + $0x6] ss:$0 sm:$0xff] }
 0xabc   :  { %v7298_v56 = vpop.f32.mrb[92].mxu1 }
 0xabd   :  { %v7225_v58 = vpop.f32.mrb[88].mxu0  ;;  %v9116_v11 = vpop.f32.mrb[93].mxu1  ;;  %v7599_v0 = vsel %vm181_vm1, %v7298_v56, 0.0 }
 0xabe   :  { %v7597_v59 = vsel %vm181_vm1, %v7225_v58, 0.0  ;;  %v9111_v61 = vpop.f32.mrb[89].mxu0 }
 0xabf   :  { %v7598_v62 = vadd.f32 %v7597_v59, %v7596_v53  ;;  %v9531_v59 = vld [vmem:[%s10692_s0 + $0x8] sm:$0xff] }
 0xac1   :  { %v7600_v2 = vadd.f32 %v7599_v0, %v7598_v62  ;;  %v9532_v62 = vld [vmem:[%s10692_s0] sm:$0xff] }
 0xac3   :  { %v7613_v4 = vadd.f32 %v8019_v1, %v7600_v2 }
 0xac4   :  { %v7444_v5 = vpop.f32.mrb[94].mxu1 }
 0xac5   :  { %v7371_v6 = vpop.f32.mrb[90].mxu0  ;;  %v7602_v7 = vsel %vm181_vm1, %v7444_v5, 0.0  ;;  %v9126_v8 = vpop.f32.mrb[95].mxu1  ;;  %v7615_v9 = vadd.f32 %v7613_v4, %v10179_v16 }
 0xac6   :  { %v7601_v10 = vsel %vm181_vm1, %v7371_v6, 0.0  ;;  %v9121_v12 = vpop.f32.mrb[91].mxu0 }
 0xac7   :  { %v7603_v13 = vadd.f32 %v7602_v7, %v7601_v10  ;;  %v7619_v14 = vsel %vm181_vm1, %v7615_v9, 0.0 }
 0xac8   :  { %7620 = vadd.xlane.f32.xlu0 %v7619_v14 }
 0xacc   :  { %v7590_v15 = vpop.f32.mrb[96].mxu1 }
 0xacd   :  { %v7517_v3 = vpop.f32.mrb[92].mxu0  ;;  %v9136_v17 = vpop.f32.mrb[97].mxu1  ;;  %v7606_v37 = vsel %vm181_vm1, %v7590_v15, 0.0 }
 0xace   :  { %v7604_v18 = vsel %vm181_vm1, %v7517_v3, 0.0  ;;  %v9131_v19 = vpop.f32.mrb[93].mxu0 }
 0xacf   :  { %v7605_v40 = vadd.f32 %v7604_v18, %v7603_v13 }
 0xad1   :  { %v7607_v20 = vadd.f32 %v7606_v37, %v7605_v40 }
 0xad3   :  { %v7614_v21 = vadd.f32 %v8019_v1, %v7607_v20  ;;  %v8025_v20 = vld [vmem:[%s10698_s6 + $0x7] ss:$0 sm:$0xff] }
 0xad5   :  { %v7616_v16 = vadd.f32 %v7614_v21, %v10213_v51  ;;  %v7657_v51 = vld [vmem:[%s10697_s5] sm:$0xff] }
 0xad6   :  { %v9436_v57 = vpack.c.bf16 %v7658_v28, %v7657_v51 }
 0xad7   :  { %v7622_v22 = vsel %vm181_vm1, %v7616_v16, 0.0 }
 0xad8   :  { %7623 = vadd.xlane.f32.xlu1 %v7622_v22  ;;  %9437 = vmatprep.subr.bf16.mxu0 %v9436_v57 }
 0xad9   :  { %9439 = vmatpush3.bf16.msra.mxu0 %v9436_v57 }
 0xada   :  { %9441 = vmatprep.subr.bf16.mxu0 %v9440_v30 }
 0xadd   :  { %9443 = vmatpush3.bf16.msra.mxu0 %v9440_v30 }
 0xb55   :  { %v7621_v23 = vpop.xlane.xlu0 %7620 }
 0xb56   :  { %v7625_v48 = vmul.f32 0.03125, %v7621_v23  ;;  %v8026_v23 = vld [vmem:[%s10698_s6 + $0x8] ss:$0 sm:$0xff] }
 0xb58   :  { %v7627_v44 = vsub.f32 %v7615_v9, %v7625_v48 }
 0xb5a   :  { %v7629_v24 = vmul.f32 %v7627_v44, %v7627_v44 }
 0xb5c   :  { %v7631_v25 = vsel %vm181_vm1, %v7629_v24, 0.0 }
 0xb5d   :  { %7632 = vadd.xlane.f32.xlu0 %v7631_v25 }
 0xb65   :  { %v7624_v26 = vpop.xlane.xlu1 %7623 }
 0xb66   :  { %v7626_v52 = vmul.f32 0.03125, %v7624_v26 }
 0xb68   :  { %v7628_v55 = vsub.f32 %v7616_v16, %v7626_v52 }
 0xb6a   :  { %v7630_v27 = vmul.f32 %v7628_v55, %v7628_v55 }
 0xb6c   :  { %v7634_v47 = vsel %vm181_vm1, %v7630_v27, 0.0 }
 0xb6d   :  { %7635 = vadd.xlane.f32.xlu1 %v7634_v47 }
 0xbea   :  { %v7633_v31 = vpop.xlane.xlu0 %7632 }
 0xbeb   :  { %v7637_v32 = vmul.f32 0.03125, %v7633_v31 }
 0xbed   :  { %v7639_v60 = vadd.f32 1e-05, %v7637_v32 }
 0xbef   :  { %9519 = vrsqrt.f32 %v7639_v60 }
 0xbf9   :  { %v9520_v63 = vpop.eup %9519 }
 0xbfa   :  { %v7636_v35 = vpop.xlane.xlu1 %7635  ;;  %v7643_v34 = vmul.f32 %v9520_v63, %v7627_v44 }
 0xbfb   :  { %v7638_v36 = vmul.f32 0.03125, %v7636_v35 }
 0xbfc   :  { %v7649_v39 = vmul.f32 %v8020_v33, %v7643_v34 }
 0xbfd   :  { %v7640_v41 = vadd.f32 1e-05, %v7638_v36 }
 0xbfe   :  { %v7655_v43 = vadd.f32 %v8021_v38, %v7649_v39 }
 0xbff   :  { %9521 = vrsqrt.f32 %v7640_v41 }
 0xc00   :  { %9145 = vmatprep.mubr.msk.f32.mxu0 %vm181_vm1, %v7655_v43 }
 0xc09   :  { %v9522_v45 = vpop.eup %9521 }
 0xc0a   :  { %v7644_v46 = vmul.f32 %v9522_v45, %v7628_v55 }
 0xc0c   :  { %v7650_v49 = vmul.f32 %v8020_v33, %v7644_v46 }
 0xc0e   :  { %v7656_v50 = vadd.f32 %v8021_v38, %v7650_v49 }
 0xc10   :  { %9146 = vmatmul.mubr.msk.f32.vlgmr.msra.gmra.mrb[94].mxu0 %vm181_vm1, %v7656_v50 }
 0xce3   :  { %v9147_v53 = vpop.f32.mrb[94].mxu0 }
 0xce4   :  { %v7748_v56 = vadd.f32 %v9147_v53, %v8024_v42  ;;  %v7733_v58 = vpop.f32.mrb[95].mxu0 }
 0xce5   :  { %v7747_v11 = vadd.f32 %v8024_v42, %v7733_v58 }
 0xce6   :  { %v7750_v61 = vadd.f32 %v9531_v59, %v7748_v56 }
 0xce7   :  { %v7749_v0 = vadd.f32 %v9532_v62, %v7747_v11 }
 0xce8   :  { %v7756_v1 = vsel %vm181_vm1, %v7750_v61, 0.0 }
 0xce9   :  { %7757 = vadd.xlane.f32.xlu1 %v7756_v1  ;;  %v7753_v2 = vsel %vm181_vm1, %v7749_v0, 0.0 }
 0xcea   :  { %7754 = vadd.xlane.f32.xlu0 %v7753_v2 }
 0xd76   :  { %v7758_v4 = vpop.xlane.xlu1 %7757 }
 0xd77   :  { %v7760_v5 = vmul.f32 0.03125, %v7758_v4  ;;  %v7755_v6 = vpop.xlane.xlu0 %7754 }
 0xd78   :  { %v7759_v7 = vmul.f32 0.03125, %v7755_v6 }
 0xd79   :  { %v7762_v8 = vsub.f32 %v7750_v61, %v7760_v5 }
 0xd7a   :  { %v7761_v9 = vsub.f32 %v7749_v0, %v7759_v7 }
 0xd7b   :  { %v7764_v10 = vmul.f32 %v7762_v8, %v7762_v8 }
 0xd7c   :  { %v7763_v12 = vmul.f32 %v7761_v9, %v7761_v9 }
 0xd7d   :  { %v7768_v13 = vsel %vm181_vm1, %v7764_v10, 0.0 }
 0xd7e   :  { %7769 = vadd.xlane.f32.xlu1 %v7768_v13  ;;  %v7765_v14 = vsel %vm181_vm1, %v7763_v12, 0.0 }
 0xd7f   :  { %7766 = vadd.xlane.f32.xlu0 %v7765_v14 }
 0xe0b   :  { %v7770_v15 = vpop.xlane.xlu1 %7769 }
 0xe0c   :  { %v7772_v3 = vmul.f32 0.03125, %v7770_v15  ;;  %v7767_v17 = vpop.xlane.xlu0 %7766 }
 0xe0d   :  { %v7771_v18 = vmul.f32 0.03125, %v7767_v17 }
 0xe0e   :  { %v7774_v19 = vadd.f32 1e-05, %v7772_v3 }
 0xe0f   :  { %v7773_v40 = vadd.f32 1e-05, %v7771_v18 }
 0xe10   :  { %9523 = vrsqrt.f32 %v7774_v19 }
 0xe11   :  { %9525 = vrsqrt.f32 %v7773_v40 }
 0xe1a   :  { %v9524_v37 = vpop.eup %9523 }
 0xe1b   :  { %v9526_v21 = vpop.eup %9525  ;;  %v7778_v16 = vmul.f32 %v9524_v37, %v7762_v8 }
 0xe1c   :  { %v7777_v22 = vmul.f32 %v9526_v21, %v7761_v9 }
 0xe1d   :  { %v7784_v48 = vmul.f32 %v8025_v20, %v7778_v16 }
 0xe1e   :  { %v7783_v44 = vmul.f32 %v8025_v20, %v7777_v22 }
 0xe1f   :  { %v7790_v24 = vadd.f32 %v8026_v23, %v7784_v48 }
 0xe20   :  { %v7789_v25 = vadd.f32 %v8026_v23, %v7783_v44 }
 0xe21   :  { %7792 = vst.msk [vmem:[#allocation2 + $0x8] sm:$0xff] %vm181_vm1, %v7790_v24 }
 0xe22   :  { %7791 = vst.msk [vmem:[#allocation2] sm:$0xff] %vm181_vm1, %v7789_v25 }
 0xe23   :  { %9544 = shalt.err (!%p9541_p4)
}
 0xe24   :  { %s9545_s8 = scalar_lea.hbm %s10699_s7, 256 }
 0xe25   :  { %p9546_p5 = scmp.ne.s32.totalorder %s10699_s7, %s9545_s8  ;;  %p9549_p6 = scmp.lt.u32.totalorder %s9545_s8, %s10699_s7 }
 0xe27   :  { %p9551_p7 = pnand %p9549_p6, %p9546_p5 }
 0xe29   :  { %9554 = shalt.err (!%p9551_p7)
}
 0xe2a   :  { %s9562_s12 = smov 128   ;;  %s9563_s13 = smov 8  }
 0xe2b   :  { %7804 = dma.vmem_to_hbm [thread:$0]  %s7799_s28, 256, %s10699_s7, [#allocation3], %s9562_s12, %s9562_s12, %s9563_s13  }
 0xe2c   :  { %9555 = dma.done.wait [#allocation3], 256  }
 0xe2d   :  { %9556 = vsyncadd [#allocation3], 4294967040 }
 0xe2e   :  { %7808 = vsyncpa [#allocation3], 1 }

</bundles_post_ra>
